<compile_context>
chip_gen: v5e
topology: v5e:2x2
jax: 0.10.0
libtpu: 0.0.40
codegen_flags: <defaults>
</compile_context>

<pallas_src>
import functools

import jax
import jax.numpy as jnp
import numpy as np
from jax import lax
from jax.experimental import pallas as pl
from jax.experimental.pallas import tpu as pltpu


# ----------------------------------------------------------------------------
# Pallas kernel: one grid step == TB RWA timesteps (decay variant, tanh act).
# ----------------------------------------------------------------------------
def _rwa_block_kernel(
    x_ref,                               # (TB, B, F)   time-major input block
    n0_ref, d0_ref, h0_ref, amax0_ref,   # (B, Cp)      initial state (padded)
    wx_ref,                              # (F, 4*Cp)    [wu | wgx | wax | wdx], matmul_dtype
    wh_ref,                              # (Cp, 3*Cp)   [wgh | wah | wdh], f32
    bx_ref,                              # (1, 4*Cp)    [bu | bg | 0 | 0], f32
    wo_ref,                              # (Cp, Op)     matmul_dtype
    bo_ref,                              # (1, Op)      f32
    outs_ref,                            # (TB, B, Op)  per-block output (time-major)
    n_ref, d_ref, h_ref, amax_ref,       # (B, Cp)      resident state accumulators
    xp_ref,                              # VMEM (TB, B, 4*Cp) f32: fused x-projection
    hs_ref,                              # VMEM (TB, B, Cp)  f32: h per step
    *, matmul_dtype, approx_reciprocal, unroll_steps,
):
    blk = pl.program_id(0)
    TB, B, F = x_ref.shape
    Cp = n_ref.shape[1]
    Op = wo_ref.shape[1]
    f32 = jnp.float32

    # Initialize resident state accumulators at the first time block.
    @pl.when(blk == 0)
    def _():
        n_ref[...] = n0_ref[...]
        d_ref[...] = d0_ref[...]
        h_ref[...] = h0_ref[...]
        amax_ref[...] = amax0_ref[...]

    # Fused x-projection for ALL TB timesteps of this block: one MXU call.
    # Result is parked in VMEM scratch (not kept live in vregs across the loop).
    x2d = x_ref[...].reshape(TB * B, F).astype(matmul_dtype)     # rows ordered (t, b)
    xp = (jnp.dot(x2d, wx_ref[...], preferred_element_type=f32)
          + bx_ref[...])                                         # (TB*B, 4*Cp), f32
    xp_ref[...] = xp.reshape(TB, B, 4 * Cp)

    wh = wh_ref[...]                                             # (Cp, 3*Cp), f32, loop-invariant

    def step(t, carry):
        n_t, d_t, h_t, a_max_t = carry
        xp_t = xp_ref[t]                                         # (B, 4*Cp) from VMEM
        hp = jnp.dot(h_t, wh, preferred_element_type=f32)        # (B, 3*Cp)

        u_t = xp_t[:, 0:Cp]
        g_t = xp_t[:, Cp:2 * Cp] + hp[:, 0:Cp]
        a_t = xp_t[:, 2 * Cp:3 * Cp] + hp[:, Cp:2 * Cp]
        pre_d = xp_t[:, 3 * Cp:4 * Cp] + hp[:, 2 * Cp:3 * Cp]
        # sigmoid(x) == 0.5 * (1 + tanh(0.5 * x)) exactly: one EUP op fewer.
        decay = 0.5 * (1.0 + jnp.tanh(0.5 * pre_d))

        z_t = u_t * jnp.tanh(g_t)

        a_decay = a_max_t * jnp.exp(-decay)
        a_newmax = jnp.maximum(a_decay, a_t)
        # exp(-decay) * exp(a_max - a_newmax) folded into a single exp.
        decay_factor = jnp.exp(a_max_t - decay - a_newmax)
        exp_scaled = jnp.exp(a_t - a_newmax)

        n_new = n_t * decay_factor + z_t * exp_scaled
        d_new = d_t * decay_factor + exp_scaled
        if approx_reciprocal:
            h_new = jnp.tanh(n_new * pl.reciprocal(d_new, approx=True))
        else:
            h_new = jnp.tanh(n_new / d_new)

        # Full-tile (B, Cp) store for the deferred output projection.
        hs_ref[t] = h_new
        return (n_new, d_new, h_new, a_newmax)

    n_t, d_t, h_t, a_max_t = lax.fori_loop(
        0, TB, step,
        (n_ref[...], d_ref[...], h_ref[...], amax_ref[...]),
        unroll=unroll_steps)

    # Write back the recurrent state (resident across grid steps).
    n_ref[...] = n_t
    d_ref[...] = d_t
    h_ref[...] = h_t
    amax_ref[...] = a_max_t

    # Deferred output projection: one matmul + one lane-dense block store.
    hs = hs_ref[...].reshape(TB * B, Cp).astype(matmul_dtype)
    o_blk = (jnp.dot(hs, wo_ref[...], preferred_element_type=f32)
             + bo_ref[...])                                      # (TB*B, Op)
    outs_ref[...] = o_blk.reshape(TB, B, Op)


def _round_up(x, m):
    return ((x + m - 1) // m) * m


def _choose_time_block(T, target):
    """Largest time block <= target that divides T (TB is a leading block dim,
    so no (8,128) alignment constraint applies to it)."""
    target = max(1, min(target, T))
    for tb in range(target, 0, -1):
        if T % tb == 0:
            return tb
    return 1


# ----------------------------------------------------------------------------
# Wrapper: parameter plumbing + pallas_call setup (stepwise forward, decay=True).
# ----------------------------------------------------------------------------
@functools.partial(
    jax.jit, static_argnames=("block_t", "matmul_dtype", "approx_reciprocal"))
def rwa_forward(x, hidden, params, *, block_t=64,
                matmul_dtype=jnp.float32, approx_reciprocal=True):
    """x: (B, T, F) f32.  hidden = (s, n, d, h, a_max), each (B, C) f32.

    Returns (outs, (s, n_t, d_t, h_t, a_newmax)) with outs: (B, T, num_classes).
    """
    s, n0, d0, h0, amax0 = hidden
    B, T, F = x.shape
    C = n0.shape[1]
    O = params["wo"].shape[1]

    Cp = _round_up(C, 128)   # lane-aligned cell width
    Op = _round_up(O, 128)   # lane-dense output width

    # RWA.forward: h_t = h + activation(s)   (glue, cheap elementwise).
    h_start = h0 + jnp.tanh(s)

    TB = _choose_time_block(T, block_t)
    n_blocks = T // TB
    # NOTE: for MXU row utilization want B*TB >= 128 (v5e) / 256 (v6e/v7x).
    unroll_steps = TB if TB <= 16 else 8

    def pad_cols(w, cols):
        return jnp.pad(w, ((0, 0), (0, cols - w.shape[1])))

    def pad_rows_cols(w, rows, cols):
        return jnp.pad(w, ((0, rows - w.shape[0]), (0, cols - w.shape[1])))

    # Lane-aligned fused weights / biases, pre-cast in the wrapper so the kernel
    # never re-casts a full weight per grid step.
    wx_cat = jnp.concatenate(
        [pad_cols(params["wu"], Cp), pad_cols(params["wgx"], Cp),
         pad_cols(params["wax"], Cp), pad_cols(params["wdx"], Cp)],
        axis=1).astype(matmul_dtype)                                  # (F, 4*Cp)
    # Recurrent projection stays f32 (bf16 here compounds error over long T).
    wh_cat = jnp.concatenate(
        [pad_rows_cols(params["wgh"], Cp, Cp),
         pad_rows_cols(params["wah"], Cp, Cp),
         pad_rows_cols(params["wdh"], Cp, Cp)],
        axis=1).astype(jnp.float32)                                   # (Cp, 3*Cp)
    bx_cat = jnp.concatenate(
        [pad_cols(params["bu"], Cp), pad_cols(params["bg"], Cp),
         jnp.zeros((1, 2 * Cp), jnp.float32)], axis=1)                # (1, 4*Cp)
    wo_p = pad_rows_cols(params["wo"], Cp, Op).astype(matmul_dtype)   # (Cp, Op)
    bo_p = pad_cols(params["bo"], Op)                                 # (1, Op)

    # Zero-pad the recurrent state along cells; padded h columns stay exactly 0
    # for all timesteps (zero weight columns/rows), so results are unaffected.
    pad_state = lambda v: jnp.pad(v, ((0, 0), (0, Cp - C)))
    n0_p = pad_state(n0)
    d0_p = pad_state(d0)
    h0_p = pad_state(h_start)
    amax0_p = pad_state(amax0)

    # Time-major input so per-step stores/loads are full (B, Cp) tiles.
    x_tm = jnp.transpose(x, (1, 0, 2))                                # (T, B, F)

    state_spec = pl.BlockSpec((B, Cp), lambda i: (0, 0))
    full = lambda shape: pl.BlockSpec(shape, lambda i: (0, 0))

    out_shapes = (
        jax.ShapeDtypeStruct((T, B, Op), jnp.float32),   # outs (time-major, padded)
        jax.ShapeDtypeStruct((B, Cp), jnp.float32),      # n_t
        jax.ShapeDtypeStruct((B, Cp), jnp.float32),      # d_t
        jax.ShapeDtypeStruct((B, Cp), jnp.float32),      # h_t
        jax.ShapeDtypeStruct((B, Cp), jnp.float32),      # a_newmax
    )

    kernel = functools.partial(
        _rwa_block_kernel,
        matmul_dtype=matmul_dtype,
        approx_reciprocal=approx_reciprocal,
        unroll_steps=unroll_steps,
    )

    outs_tm, n_t, d_t, h_t, a_newmax = pl.pallas_call(
        kernel,
        out_shape=out_shapes,
        grid_spec=pltpu.PrefetchScalarGridSpec(
            num_scalar_prefetch=0,
            grid=(n_blocks,),
            in_specs=[
                pl.BlockSpec((TB, B, F), lambda i: (i, 0, 0)),   # x block
                state_spec, state_spec, state_spec, state_spec,  # n0,d0,h0,amax0
                full((F, 4 * Cp)),                               # fused x weights
                full((Cp, 3 * Cp)),                              # fused h weights
                full((1, 4 * Cp)),                               # fused biases
                full((Cp, Op)), full((1, Op)),                   # wo, bo
            ],
            out_specs=[
                pl.BlockSpec((TB, B, Op), lambda i: (i, 0, 0)),  # outs block
                state_spec, state_spec, state_spec, state_spec,  # n,d,h,a_max
            ],
            scratch_shapes=[
                pltpu.VMEM((TB, B, 4 * Cp), jnp.float32),        # fused x-projection
                pltpu.VMEM((TB, B, Cp), jnp.float32),            # per-block h states
            ],
        ),
        compiler_params=pltpu.CompilerParams(
            # Sequential recurrence over time blocks.
            dimension_semantics=("arbitrary",),
            # Raise v5e's 16 MiB default scoped VMEM; safe on all generations.
            vmem_limit_bytes=32 * 1024 * 1024,
        ),
    )(
        x_tm,
        n0_p, d0_p, h0_p, amax0_p,
        wx_cat, wh_cat, bx_cat,
        wo_p, bo_p,
    )

    outs = jnp.transpose(outs_tm[:, :, :O], (1, 0, 2))               # (B, T, O)
    unpad = lambda v: v[:, :C]
    return outs, (s, unpad(n_t), unpad(d_t), unpad(h_t), unpad(a_newmax))


# ----------------------------------------------------------------------------
# Pure-JAX reference (mirrors the PyTorch module line-by-line) for validation.
# ----------------------------------------------------------------------------
def rwa_reference(x, hidden, params):
    s, n_t, d_t, h, a_max_t = hidden
    h_t = h + jnp.tanh(s)
    T = x.shape[1]
    outs = []
    for t in range(T):
        x_t = x[:, t, :]
        u_t = x_t @ params["wu"] + params["bu"]
        g_t = x_t @ params["wgx"] + h_t @ params["wgh"] + params["bg"]
        a_t = x_t @ params["wax"] + h_t @ params["wah"]
        decay = jax.nn.sigmoid(x_t @ params["wdx"] + h_t @ params["wdh"])
        z_t = u_t * jnp.tanh(g_t)
        a_decay = a_max_t * jnp.exp(-decay)
        a_newmax = jnp.maximum(a_decay, a_t)
        exp_diff = jnp.exp(a_max_t - a_newmax)
        exp_scaled = jnp.exp(a_t - a_newmax)
        n_t = n_t * jnp.exp(-decay) * exp_diff + z_t * exp_scaled
        d_t = d_t * jnp.exp(-decay) * exp_diff + exp_scaled
        h_t = jnp.tanh(n_t / d_t)
        a_max_t = a_newmax
        outs.append(h_t @ params["wo"] + params["bo"])
    return jnp.stack(outs, axis=1), (s, n_t, d_t, h_t, a_max_t)


# ----------------------------------------------------------------------------
# Deterministic parameter / input construction and smoke test.
# ----------------------------------------------------------------------------
def init_params(key, num_features, num_cells, num_classes, init=1.0):
    F, C, O = num_features, num_cells, num_classes
    ga_f = np.sqrt(6.0 * init / (F + 2.0 * C))
    u_f = np.sqrt(6.0 * init / (F + C))
    o_f = np.sqrt(6.0 * init / (C + O))
    ks = jax.random.split(key, 8)
    unif = lambda k, shp, f: jax.random.uniform(k, shp, jnp.float32, -f, f)
    # Weights stored as (in, out); the concat weights are pre-split into
    # the x part (F, C) and the h part (C, C).
    return {
        "wu": unif(ks[0], (F, C), u_f), "bu": jnp.zeros((1, C), jnp.float32),
        "wgx": unif(ks[1], (F, C), ga_f), "wgh": unif(ks[2], (C, C), ga_f),
        "bg": jnp.zeros((1, C), jnp.float32),
        "wax": unif(ks[3], (F, C), ga_f), "wah": unif(ks[4], (C, C), ga_f),
        "wdx": unif(ks[5], (F, C), ga_f), "wdh": unif(ks[6], (C, C), ga_f),
        "wo": unif(ks[7], (C, O), o_f), "bo": jnp.zeros((1, O), jnp.float32),
    }


def init_hidden(key, batch_size, num_cells, init=1.0):
    s = init * jax.random.normal(key, (batch_size, num_cells), jnp.float32)
    zeros = jnp.zeros((batch_size, num_cells), jnp.float32)
    a_max = jnp.full((batch_size, num_cells), -1e38, jnp.float32)
    return (s, zeros, zeros, zeros, a_max)


if __name__ == "__main__":
    B, T, F, C, O = 2, 8, 4, 32, 8   # batch, seq, num_features, num_cells, num_classes

    key = jax.random.PRNGKey(0)
    k_param, k_hidden, k_x = jax.random.split(key, 3)

    params = init_params(k_param, F, C, O)
    hidden = init_hidden(k_hidden, B, C)
    x = jax.random.normal(k_x, (B, T, F), jnp.float32)

    ref_outs, (_, rn, rd, rh, ra) = rwa_reference(x, hidden, params)

    # --- Precise path: f32 matmuls, exact divide -> tight validation. ---
    # (Tolerance 1e-4: the kernel computes sigmoid via the exact tanh identity,
    #  which differs from jax.nn.sigmoid by a few f32 ulps per step.)
    outs, (s, n_t, d_t, h_t, a_newmax) = rwa_forward(
        x, hidden, params, matmul_dtype=jnp.float32, approx_reciprocal=False)
    jax.block_until_ready((outs, n_t, d_t, h_t, a_newmax))
    np.testing.assert_allclose(np.asarray(outs), np.asarray(ref_outs), rtol=1e-4, atol=1e-4)
    np.testing.assert_allclose(np.asarray(n_t), np.asarray(rn), rtol=1e-4, atol=1e-4)
    np.testing.assert_allclose(np.asarray(d_t), np.asarray(rd), rtol=1e-4, atol=1e-4)
    np.testing.assert_allclose(np.asarray(h_t), np.asarray(rh), rtol=1e-4, atol=1e-4)
    np.testing.assert_allclose(np.asarray(a_newmax), np.asarray(ra), rtol=1e-4, atol=1e-4)

    # --- Fast path: bf16 MXU x/out projections + EUP approx reciprocal. ---
    # (Recurrent h-projection stays f32, so bf16 error does not compound.)
    outs_f, (_, nf, df, hf, af) = rwa_forward(
        x, hidden, params, matmul_dtype=jnp.bfloat16, approx_reciprocal=True)
    jax.block_until_ready((outs_f, nf, df, hf, af))
    np.testing.assert_allclose(np.asarray(outs_f), np.asarray(ref_outs), rtol=5e-2, atol=5e-2)
    np.testing.assert_allclose(np.asarray(hf), np.asarray(rh), rtol=5e-2, atol=5e-2)

    print("KERNEL_OK")
</pallas_src>

<mosaic_0001>
module attributes {stable_mosaic.version = 11 : i64} {
  func.func @_rwa_block_kernel(%arg0: i32, %arg1: memref<8x2x4xf32, #tpu.memory_space<vmem>>, %arg2: memref<2x128xf32, #tpu.memory_space<vmem>>, %arg3: memref<2x128xf32, #tpu.memory_space<vmem>>, %arg4: memref<2x128xf32, #tpu.memory_space<vmem>>, %arg5: memref<2x128xf32, #tpu.memory_space<vmem>>, %arg6: memref<4x512xf32, #tpu.memory_space<vmem>>, %arg7: memref<128x384xf32, #tpu.memory_space<vmem>>, %arg8: memref<1x512xf32, #tpu.memory_space<vmem>>, %arg9: memref<128x128xf32, #tpu.memory_space<vmem>>, %arg10: memref<1x128xf32, #tpu.memory_space<vmem>>, %arg11: memref<8x2x128xf32, #tpu.memory_space<vmem>>, %arg12: memref<2x128xf32, #tpu.memory_space<vmem>>, %arg13: memref<2x128xf32, #tpu.memory_space<vmem>>, %arg14: memref<2x128xf32, #tpu.memory_space<vmem>>, %arg15: memref<2x128xf32, #tpu.memory_space<vmem>>, %arg16: memref<8x2x512xf32, #tpu.memory_space<vmem>>, %arg17: memref<8x2x128xf32, #tpu.memory_space<vmem>>) attributes {dimension_semantics = [#tpu.dimension_semantics<arbitrary>], iteration_bounds = array<i64: 1>, scalar_prefetch = 0 : i64, scratch_operands = 2 : i64, tpu.core_type = #tpu.core_type<tc>, window_params = [{transform_indices = @transform_0, window_bounds = array<i64: 8, 2, 4>}, {pipeline_mode = #tpu.pipeline_mode<synchronous>, transform_indices = @transform_1, window_bounds = array<i64: 2, 128>}, {pipeline_mode = #tpu.pipeline_mode<synchronous>, transform_indices = @transform_2, window_bounds = array<i64: 2, 128>}, {pipeline_mode = #tpu.pipeline_mode<synchronous>, transform_indices = @transform_3, window_bounds = array<i64: 2, 128>}, {pipeline_mode = #tpu.pipeline_mode<synchronous>, transform_indices = @transform_4, window_bounds = array<i64: 2, 128>}, {pipeline_mode = #tpu.pipeline_mode<synchronous>, transform_indices = @transform_5, window_bounds = array<i64: 4, 512>}, {pipeline_mode = #tpu.pipeline_mode<synchronous>, transform_indices = @transform_6, window_bounds = array<i64: 128, 384>}, {pipeline_mode = #tpu.pipeline_mode<synchronous>, transform_indices = @transform_7, window_bounds = array<i64: 1, 512>}, {pipeline_mode = #tpu.pipeline_mode<synchronous>, transform_indices = @transform_8, window_bounds = array<i64: 128, 128>}, {pipeline_mode = #tpu.pipeline_mode<synchronous>, transform_indices = @transform_9, window_bounds = array<i64: 1, 128>}, {transform_indices = @transform_10, window_bounds = array<i64: 8, 2, 128>}, {pipeline_mode = #tpu.pipeline_mode<synchronous>, transform_indices = @transform_11, window_bounds = array<i64: 2, 128>}, {pipeline_mode = #tpu.pipeline_mode<synchronous>, transform_indices = @transform_12, window_bounds = array<i64: 2, 128>}, {pipeline_mode = #tpu.pipeline_mode<synchronous>, transform_indices = @transform_13, window_bounds = array<i64: 2, 128>}, {pipeline_mode = #tpu.pipeline_mode<synchronous>, transform_indices = @transform_14, window_bounds = array<i64: 2, 128>}]} {
    %c0_i32 = arith.constant 0 : i32
    %0 = arith.cmpi eq, %arg0, %c0_i32 : i32
    %1 = arith.extui %0 : i1 to i32
    %c0_i32_0 = arith.constant 0 : i32
    %2 = arith.cmpi ne, %1, %c0_i32_0 : i32
    scf.if %2 {
      %c0_112 = arith.constant 0 : index
      %c0_113 = arith.constant 0 : index
      %382 = vector.load %arg2[%c0_112, %c0_113] : memref<2x128xf32, #tpu.memory_space<vmem>>, vector<2x128xf32>
      %c0_114 = arith.constant 0 : index
      %c0_115 = arith.constant 0 : index
      %383 = vector.load %arg12[%c0_114, %c0_115] : memref<2x128xf32, #tpu.memory_space<vmem>>, vector<2x128xf32>
      tpu.vector_store %arg12[%c0_114, %c0_115], %382 {strides = array<i32>} : memref<2x128xf32, #tpu.memory_space<vmem>>, vector<2x128xf32>,
      %c0_116 = arith.constant 0 : index
      %c0_117 = arith.constant 0 : index
      %384 = vector.load %arg3[%c0_116, %c0_117] : memref<2x128xf32, #tpu.memory_space<vmem>>, vector<2x128xf32>
      %c0_118 = arith.constant 0 : index
      %c0_119 = arith.constant 0 : index
      %385 = vector.load %arg13[%c0_118, %c0_119] : memref<2x128xf32, #tpu.memory_space<vmem>>, vector<2x128xf32>
      tpu.vector_store %arg13[%c0_118, %c0_119], %384 {strides = array<i32>} : memref<2x128xf32, #tpu.memory_space<vmem>>, vector<2x128xf32>,
      %c0_120 = arith.constant 0 : index
      %c0_121 = arith.constant 0 : index
      %386 = vector.load %arg4[%c0_120, %c0_121] : memref<2x128xf32, #tpu.memory_space<vmem>>, vector<2x128xf32>
      %c0_122 = arith.constant 0 : index
      %c0_123 = arith.constant 0 : index
      %387 = vector.load %arg14[%c0_122, %c0_123] : memref<2x128xf32, #tpu.memory_space<vmem>>, vector<2x128xf32>
      tpu.vector_store %arg14[%c0_122, %c0_123], %386 {strides = array<i32>} : memref<2x128xf32, #tpu.memory_space<vmem>>, vector<2x128xf32>,
      %c0_124 = arith.constant 0 : index
      %c0_125 = arith.constant 0 : index
      %388 = vector.load %arg5[%c0_124, %c0_125] : memref<2x128xf32, #tpu.memory_space<vmem>>, vector<2x128xf32>
      %c0_126 = arith.constant 0 : index
      %c0_127 = arith.constant 0 : index
      %389 = vector.load %arg15[%c0_126, %c0_127] : memref<2x128xf32, #tpu.memory_space<vmem>>, vector<2x128xf32>
      tpu.vector_store %arg15[%c0_126, %c0_127], %388 {strides = array<i32>} : memref<2x128xf32, #tpu.memory_space<vmem>>, vector<2x128xf32>,
    } else {
    }
    %c0 = arith.constant 0 : index
    %c0_1 = arith.constant 0 : index
    %c0_2 = arith.constant 0 : index
    %3 = vector.load %arg1[%c0, %c0_1, %c0_2] : memref<8x2x4xf32, #tpu.memory_space<vmem>>, vector<8x2x4xf32>
    %4 = vector.shape_cast %3 : vector<8x2x4xf32> to vector<16x4xf32>
    %c0_3 = arith.constant 0 : index
    %c0_4 = arith.constant 0 : index
    %5 = vector.load %arg6[%c0_3, %c0_4] : memref<4x512xf32, #tpu.memory_space<vmem>>, vector<4x512xf32>
    %cst = arith.constant dense<0.000000e+00> : vector<16x512xf32>
    %6 = tpu.matmul %4, %5, %cst {dimension_numbers = #tpu.dot_dimension_numbers<[1], [0], [0], [1], [0, 0, 1, 1], [], []>} : vector<16x4xf32>, vector<4x512xf32>, vector<16x512xf32> -> vector<16x512xf32>
    %c0_5 = arith.constant 0 : index
    %c0_6 = arith.constant 0 : index
    %7 = vector.load %arg8[%c0_5, %c0_6] : memref<1x512xf32, #tpu.memory_space<vmem>>, vector<1x512xf32>
    %8 = vector.broadcast %7 : vector<1x512xf32> to vector<16x512xf32>
    %9 = arith.addf %6, %8 : vector<16x512xf32>
    %10 = vector.shape_cast %9 : vector<16x512xf32> to vector<8x2x512xf32>
    %c0_7 = arith.constant 0 : index
    %c0_8 = arith.constant 0 : index
    %c0_9 = arith.constant 0 : index
    %11 = vector.load %arg16[%c0_7, %c0_8, %c0_9] : memref<8x2x512xf32, #tpu.memory_space<vmem>>, vector<8x2x512xf32>
    tpu.vector_store %arg16[%c0_7, %c0_8, %c0_9], %10 {strides = array<i32>} : memref<8x2x512xf32, #tpu.memory_space<vmem>>, vector<8x2x512xf32>,
    %c0_10 = arith.constant 0 : index
    %c0_11 = arith.constant 0 : index
    %12 = vector.load %arg7[%c0_10, %c0_11] : memref<128x384xf32, #tpu.memory_space<vmem>>, vector<128x384xf32>
    %c0_12 = arith.constant 0 : index
    %c0_13 = arith.constant 0 : index
    %13 = vector.load %arg12[%c0_12, %c0_13] : memref<2x128xf32, #tpu.memory_space<vmem>>, vector<2x128xf32>
    %c0_14 = arith.constant 0 : index
    %c0_15 = arith.constant 0 : index
    %14 = vector.load %arg13[%c0_14, %c0_15] : memref<2x128xf32, #tpu.memory_space<vmem>>, vector<2x128xf32>
    %c0_16 = arith.constant 0 : index
    %c0_17 = arith.constant 0 : index
    %15 = vector.load %arg14[%c0_16, %c0_17] : memref<2x128xf32, #tpu.memory_space<vmem>>, vector<2x128xf32>
    %c0_18 = arith.constant 0 : index
    %c0_19 = arith.constant 0 : index
    %16 = vector.load %arg15[%c0_18, %c0_19] : memref<2x128xf32, #tpu.memory_space<vmem>>, vector<2x128xf32>
    %c0_i32_20 = arith.constant 0 : i32
    %17 = arith.index_cast %c0_i32_20 : i32 to index
    %c0_21 = arith.constant 0 : index
    %c0_22 = arith.constant 0 : index
    %18 = vector.load %arg16[%17, %c0_21, %c0_22] : memref<8x2x512xf32, #tpu.memory_space<vmem>>, vector<1x2x512xf32>
    %19 = vector.shape_cast %18 : vector<1x2x512xf32> to vector<2x512xf32>
    %cst_23 = arith.constant dense<0.000000e+00> : vector<2x384xf32>
    %20 = tpu.matmul %15, %12, %cst_23 {dimension_numbers = #tpu.dot_dimension_numbers<[1], [0], [0], [1], [0, 0, 1, 1], [], []>} : vector<2x128xf32>, vector<128x384xf32>, vector<2x384xf32> -> vector<2x384xf32>
    %21 = vector.extract_strided_slice %19 {offsets = [0, 0], sizes = [2, 128], strides = [1, 1]} : vector<2x512xf32> to vector<2x128xf32>
    %22 = vector.extract_strided_slice %19 {offsets = [0, 128], sizes = [2, 128], strides = [1, 1]} : vector<2x512xf32> to vector<2x128xf32>
    %23 = vector.extract_strided_slice %20 {offsets = [0, 0], sizes = [2, 128], strides = [1, 1]} : vector<2x384xf32> to vector<2x128xf32>
    %24 = arith.addf %22, %23 : vector<2x128xf32>
    %25 = vector.extract_strided_slice %19 {offsets = [0, 256], sizes = [2, 128], strides = [1, 1]} : vector<2x512xf32> to vector<2x128xf32>
    %26 = vector.extract_strided_slice %20 {offsets = [0, 128], sizes = [2, 128], strides = [1, 1]} : vector<2x384xf32> to vector<2x128xf32>
    %27 = arith.addf %25, %26 : vector<2x128xf32>
    %28 = vector.extract_strided_slice %19 {offsets = [0, 384], sizes = [2, 128], strides = [1, 1]} : vector<2x512xf32> to vector<2x128xf32>
    %29 = vector.extract_strided_slice %20 {offsets = [0, 256], sizes = [2, 128], strides = [1, 1]} : vector<2x384xf32> to vector<2x128xf32>
    %30 = arith.addf %28, %29 : vector<2x128xf32>
    %cst_24 = arith.constant 5.000000e-01 : f32
    %31 = vector.broadcast %cst_24 : f32 to vector<2x128xf32>
    %32 = arith.mulf %31, %30 : vector<2x128xf32>
    %33 = math.tanh %32 : vector<2x128xf32>
    %cst_25 = arith.constant 1.000000e+00 : f32
    %34 = vector.broadcast %cst_25 : f32 to vector<2x128xf32>
    %35 = arith.addf %34, %33 : vector<2x128xf32>
    %cst_26 = arith.constant 5.000000e-01 : f32
    %36 = vector.broadcast %cst_26 : f32 to vector<2x128xf32>
    %37 = arith.mulf %36, %35 : vector<2x128xf32>
    %38 = math.tanh %24 : vector<2x128xf32>
    %39 = arith.mulf %21, %38 : vector<2x128xf32>
    %cst_27 = arith.constant 0.000000e+00 : f32
    %40 = vector.broadcast %cst_27 : f32 to vector<2x128xf32>
    %41 = arith.subf %40, %37 : vector<2x128xf32>
    %42 = math.exp %41 : vector<2x128xf32>
    %43 = arith.mulf %16, %42 : vector<2x128xf32>
    %44 = arith.maximumf %43, %27 : vector<2x128xf32>
    %45 = arith.subf %16, %37 : vector<2x128xf32>
    %46 = arith.subf %45, %44 : vector<2x128xf32>
    %47 = math.exp %46 : vector<2x128xf32>
    %48 = arith.subf %27, %44 : vector<2x128xf32>
    %49 = math.exp %48 : vector<2x128xf32>
    %50 = arith.mulf %13, %47 : vector<2x128xf32>
    %51 = arith.mulf %39, %49 : vector<2x128xf32>
    %52 = arith.addf %50, %51 : vector<2x128xf32>
    %53 = arith.mulf %14, %47 : vector<2x128xf32>
    %54 = arith.addf %53, %49 : vector<2x128xf32>
    %55 = arith.divf %52, %54 : vector<2x128xf32>
    %56 = math.tanh %55 : vector<2x128xf32>
    %57 = arith.index_cast %c0_i32_20 : i32 to index
    %c0_28 = arith.constant 0 : index
    %c0_29 = arith.constant 0 : index
    %58 = vector.load %arg17[%57, %c0_28, %c0_29] : memref<8x2x128xf32, #tpu.memory_space<vmem>>, vector<1x2x128xf32>
    %59 = vector.shape_cast %58 : vector<1x2x128xf32> to vector<2x128xf32>
    %60 = vector.shape_cast %56 : vector<2x128xf32> to vector<1x2x128xf32>
    tpu.vector_store %arg17[%57, %c0_28, %c0_29], %60 {strides = array<i32>} : memref<8x2x128xf32, #tpu.memory_space<vmem>>, vector<1x2x128xf32>,
    %c1_i32 = arith.constant 1 : i32
    %61 = arith.index_cast %c1_i32 : i32 to index
    %c0_30 = arith.constant 0 : index
    %c0_31 = arith.constant 0 : index
    %62 = vector.load %arg16[%61, %c0_30, %c0_31] : memref<8x2x512xf32, #tpu.memory_space<vmem>>, vector<1x2x512xf32>
    %63 = vector.shape_cast %62 : vector<1x2x512xf32> to vector<2x512xf32>
    %cst_32 = arith.constant dense<0.000000e+00> : vector<2x384xf32>
    %64 = tpu.matmul %56, %12, %cst_32 {dimension_numbers = #tpu.dot_dimension_numbers<[1], [0], [0], [1], [0, 0, 1, 1], [], []>} : vector<2x128xf32>, vector<128x384xf32>, vector<2x384xf32> -> vector<2x384xf32>
    %65 = vector.extract_strided_slice %63 {offsets = [0, 0], sizes = [2, 128], strides = [1, 1]} : vector<2x512xf32> to vector<2x128xf32>
    %66 = vector.extract_strided_slice %63 {offsets = [0, 128], sizes = [2, 128], strides = [1, 1]} : vector<2x512xf32> to vector<2x128xf32>
    %67 = vector.extract_strided_slice %64 {offsets = [0, 0], sizes = [2, 128], strides = [1, 1]} : vector<2x384xf32> to vector<2x128xf32>
    %68 = arith.addf %66, %67 : vector<2x128xf32>
    %69 = vector.extract_strided_slice %63 {offsets = [0, 256], sizes = [2, 128], strides = [1, 1]} : vector<2x512xf32> to vector<2x128xf32>
    %70 = vector.extract_strided_slice %64 {offsets = [0, 128], sizes = [2, 128], strides = [1, 1]} : vector<2x384xf32> to vector<2x128xf32>
    %71 = arith.addf %69, %70 : vector<2x128xf32>
    %72 = vector.extract_strided_slice %63 {offsets = [0, 384], sizes = [2, 128], strides = [1, 1]} : vector<2x512xf32> to vector<2x128xf32>
    %73 = vector.extract_strided_slice %64 {offsets = [0, 256], sizes = [2, 128], strides = [1, 1]} : vector<2x384xf32> to vector<2x128xf32>
    %74 = arith.addf %72, %73 : vector<2x128xf32>
    %cst_33 = arith.constant 5.000000e-01 : f32
    %75 = vector.broadcast %cst_33 : f32 to vector<2x128xf32>
    %76 = arith.mulf %75, %74 : vector<2x128xf32>
    %77 = math.tanh %76 : vector<2x128xf32>
    %cst_34 = arith.constant 1.000000e+00 : f32
    %78 = vector.broadcast %cst_34 : f32 to vector<2x128xf32>
    %79 = arith.addf %78, %77 : vector<2x128xf32>
    %cst_35 = arith.constant 5.000000e-01 : f32
    %80 = vector.broadcast %cst_35 : f32 to vector<2x128xf32>
    %81 = arith.mulf %80, %79 : vector<2x128xf32>
    %82 = math.tanh %68 : vector<2x128xf32>
    %83 = arith.mulf %65, %82 : vector<2x128xf32>
    %cst_36 = arith.constant 0.000000e+00 : f32
    %84 = vector.broadcast %cst_36 : f32 to vector<2x128xf32>
    %85 = arith.subf %84, %81 : vector<2x128xf32>
    %86 = math.exp %85 : vector<2x128xf32>
    %87 = arith.mulf %44, %86 : vector<2x128xf32>
    %88 = arith.maximumf %87, %71 : vector<2x128xf32>
    %89 = arith.subf %44, %81 : vector<2x128xf32>
    %90 = arith.subf %89, %88 : vector<2x128xf32>
    %91 = math.exp %90 : vector<2x128xf32>
    %92 = arith.subf %71, %88 : vector<2x128xf32>
    %93 = math.exp %92 : vector<2x128xf32>
    %94 = arith.mulf %52, %91 : vector<2x128xf32>
    %95 = arith.mulf %83, %93 : vector<2x128xf32>
    %96 = arith.addf %94, %95 : vector<2x128xf32>
    %97 = arith.mulf %54, %91 : vector<2x128xf32>
    %98 = arith.addf %97, %93 : vector<2x128xf32>
    %99 = arith.divf %96, %98 : vector<2x128xf32>
    %100 = math.tanh %99 : vector<2x128xf32>
    %101 = arith.index_cast %c1_i32 : i32 to index
    %c0_37 = arith.constant 0 : index
    %c0_38 = arith.constant 0 : index
    %102 = vector.load %arg17[%101, %c0_37, %c0_38] : memref<8x2x128xf32, #tpu.memory_space<vmem>>, vector<1x2x128xf32>
    %103 = vector.shape_cast %102 : vector<1x2x128xf32> to vector<2x128xf32>
    %104 = vector.shape_cast %100 : vector<2x128xf32> to vector<1x2x128xf32>
    tpu.vector_store %arg17[%101, %c0_37, %c0_38], %104 {strides = array<i32>} : memref<8x2x128xf32, #tpu.memory_space<vmem>>, vector<1x2x128xf32>,
    %c2_i32 = arith.constant 2 : i32
    %105 = arith.index_cast %c2_i32 : i32 to index
    %c0_39 = arith.constant 0 : index
    %c0_40 = arith.constant 0 : index
    %106 = vector.load %arg16[%105, %c0_39, %c0_40] : memref<8x2x512xf32, #tpu.memory_space<vmem>>, vector<1x2x512xf32>
    %107 = vector.shape_cast %106 : vector<1x2x512xf32> to vector<2x512xf32>
    %cst_41 = arith.constant dense<0.000000e+00> : vector<2x384xf32>
    %108 = tpu.matmul %100, %12, %cst_41 {dimension_numbers = #tpu.dot_dimension_numbers<[1], [0], [0], [1], [0, 0, 1, 1], [], []>} : vector<2x128xf32>, vector<128x384xf32>, vector<2x384xf32> -> vector<2x384xf32>
    %109 = vector.extract_strided_slice %107 {offsets = [0, 0], sizes = [2, 128], strides = [1, 1]} : vector<2x512xf32> to vector<2x128xf32>
    %110 = vector.extract_strided_slice %107 {offsets = [0, 128], sizes = [2, 128], strides = [1, 1]} : vector<2x512xf32> to vector<2x128xf32>
    %111 = vector.extract_strided_slice %108 {offsets = [0, 0], sizes = [2, 128], strides = [1, 1]} : vector<2x384xf32> to vector<2x128xf32>
    %112 = arith.addf %110, %111 : vector<2x128xf32>
    %113 = vector.extract_strided_slice %107 {offsets = [0, 256], sizes = [2, 128], strides = [1, 1]} : vector<2x512xf32> to vector<2x128xf32>
    %114 = vector.extract_strided_slice %108 {offsets = [0, 128], sizes = [2, 128], strides = [1, 1]} : vector<2x384xf32> to vector<2x128xf32>
    %115 = arith.addf %113, %114 : vector<2x128xf32>
    %116 = vector.extract_strided_slice %107 {offsets = [0, 384], sizes = [2, 128], strides = [1, 1]} : vector<2x512xf32> to vector<2x128xf32>
    %117 = vector.extract_strided_slice %108 {offsets = [0, 256], sizes = [2, 128], strides = [1, 1]} : vector<2x384xf32> to vector<2x128xf32>
    %118 = arith.addf %116, %117 : vector<2x128xf32>
    %cst_42 = arith.constant 5.000000e-01 : f32
    %119 = vector.broadcast %cst_42 : f32 to vector<2x128xf32>
    %120 = arith.mulf %119, %118 : vector<2x128xf32>
    %121 = math.tanh %120 : vector<2x128xf32>
    %cst_43 = arith.constant 1.000000e+00 : f32
    %122 = vector.broadcast %cst_43 : f32 to vector<2x128xf32>
    %123 = arith.addf %122, %121 : vector<2x128xf32>
    %cst_44 = arith.constant 5.000000e-01 : f32
    %124 = vector.broadcast %cst_44 : f32 to vector<2x128xf32>
    %125 = arith.mulf %124, %123 : vector<2x128xf32>
    %126 = math.tanh %112 : vector<2x128xf32>
    %127 = arith.mulf %109, %126 : vector<2x128xf32>
    %cst_45 = arith.constant 0.000000e+00 : f32
    %128 = vector.broadcast %cst_45 : f32 to vector<2x128xf32>
    %129 = arith.subf %128, %125 : vector<2x128xf32>
    %130 = math.exp %129 : vector<2x128xf32>
    %131 = arith.mulf %88, %130 : vector<2x128xf32>
    %132 = arith.maximumf %131, %115 : vector<2x128xf32>
    %133 = arith.subf %88, %125 : vector<2x128xf32>
    %134 = arith.subf %133, %132 : vector<2x128xf32>
    %135 = math.exp %134 : vector<2x128xf32>
    %136 = arith.subf %115, %132 : vector<2x128xf32>
    %137 = math.exp %136 : vector<2x128xf32>
    %138 = arith.mulf %96, %135 : vector<2x128xf32>
    %139 = arith.mulf %127, %137 : vector<2x128xf32>
    %140 = arith.addf %138, %139 : vector<2x128xf32>
    %141 = arith.mulf %98, %135 : vector<2x128xf32>
    %142 = arith.addf %141, %137 : vector<2x128xf32>
    %143 = arith.divf %140, %142 : vector<2x128xf32>
    %144 = math.tanh %143 : vector<2x128xf32>
    %145 = arith.index_cast %c2_i32 : i32 to index
    %c0_46 = arith.constant 0 : index
    %c0_47 = arith.constant 0 : index
    %146 = vector.load %arg17[%145, %c0_46, %c0_47] : memref<8x2x128xf32, #tpu.memory_space<vmem>>, vector<1x2x128xf32>
    %147 = vector.shape_cast %146 : vector<1x2x128xf32> to vector<2x128xf32>
    %148 = vector.shape_cast %144 : vector<2x128xf32> to vector<1x2x128xf32>
    tpu.vector_store %arg17[%145, %c0_46, %c0_47], %148 {strides = array<i32>} : memref<8x2x128xf32, #tpu.memory_space<vmem>>, vector<1x2x128xf32>,
    %c3_i32 = arith.constant 3 : i32
    %149 = arith.index_cast %c3_i32 : i32 to index
    %c0_48 = arith.constant 0 : index
    %c0_49 = arith.constant 0 : index
    %150 = vector.load %arg16[%149, %c0_48, %c0_49] : memref<8x2x512xf32, #tpu.memory_space<vmem>>, vector<1x2x512xf32>
    %151 = vector.shape_cast %150 : vector<1x2x512xf32> to vector<2x512xf32>
    %cst_50 = arith.constant dense<0.000000e+00> : vector<2x384xf32>
    %152 = tpu.matmul %144, %12, %cst_50 {dimension_numbers = #tpu.dot_dimension_numbers<[1], [0], [0], [1], [0, 0, 1, 1], [], []>} : vector<2x128xf32>, vector<128x384xf32>, vector<2x384xf32> -> vector<2x384xf32>
    %153 = vector.extract_strided_slice %151 {offsets = [0, 0], sizes = [2, 128], strides = [1, 1]} : vector<2x512xf32> to vector<2x128xf32>
    %154 = vector.extract_strided_slice %151 {offsets = [0, 128], sizes = [2, 128], strides = [1, 1]} : vector<2x512xf32> to vector<2x128xf32>
    %155 = vector.extract_strided_slice %152 {offsets = [0, 0], sizes = [2, 128], strides = [1, 1]} : vector<2x384xf32> to vector<2x128xf32>
    %156 = arith.addf %154, %155 : vector<2x128xf32>
    %157 = vector.extract_strided_slice %151 {offsets = [0, 256], sizes = [2, 128], strides = [1, 1]} : vector<2x512xf32> to vector<2x128xf32>
    %158 = vector.extract_strided_slice %152 {offsets = [0, 128], sizes = [2, 128], strides = [1, 1]} : vector<2x384xf32> to vector<2x128xf32>
    %159 = arith.addf %157, %158 : vector<2x128xf32>
    %160 = vector.extract_strided_slice %151 {offsets = [0, 384], sizes = [2, 128], strides = [1, 1]} : vector<2x512xf32> to vector<2x128xf32>
    %161 = vector.extract_strided_slice %152 {offsets = [0, 256], sizes = [2, 128], strides = [1, 1]} : vector<2x384xf32> to vector<2x128xf32>
    %162 = arith.addf %160, %161 : vector<2x128xf32>
    %cst_51 = arith.constant 5.000000e-01 : f32
    %163 = vector.broadcast %cst_51 : f32 to vector<2x128xf32>
    %164 = arith.mulf %163, %162 : vector<2x128xf32>
    %165 = math.tanh %164 : vector<2x128xf32>
    %cst_52 = arith.constant 1.000000e+00 : f32
    %166 = vector.broadcast %cst_52 : f32 to vector<2x128xf32>
    %167 = arith.addf %166, %165 : vector<2x128xf32>
    %cst_53 = arith.constant 5.000000e-01 : f32
    %168 = vector.broadcast %cst_53 : f32 to vector<2x128xf32>
    %169 = arith.mulf %168, %167 : vector<2x128xf32>
    %170 = math.tanh %156 : vector<2x128xf32>
    %171 = arith.mulf %153, %170 : vector<2x128xf32>
    %cst_54 = arith.constant 0.000000e+00 : f32
    %172 = vector.broadcast %cst_54 : f32 to vector<2x128xf32>
    %173 = arith.subf %172, %169 : vector<2x128xf32>
    %174 = math.exp %173 : vector<2x128xf32>
    %175 = arith.mulf %132, %174 : vector<2x128xf32>
    %176 = arith.maximumf %175, %159 : vector<2x128xf32>
    %177 = arith.subf %132, %169 : vector<2x128xf32>
    %178 = arith.subf %177, %176 : vector<2x128xf32>
    %179 = math.exp %178 : vector<2x128xf32>
    %180 = arith.subf %159, %176 : vector<2x128xf32>
    %181 = math.exp %180 : vector<2x128xf32>
    %182 = arith.mulf %140, %179 : vector<2x128xf32>
    %183 = arith.mulf %171, %181 : vector<2x128xf32>
    %184 = arith.addf %182, %183 : vector<2x128xf32>
    %185 = arith.mulf %142, %179 : vector<2x128xf32>
    %186 = arith.addf %185, %181 : vector<2x128xf32>
    %187 = arith.divf %184, %186 : vector<2x128xf32>
    %188 = math.tanh %187 : vector<2x128xf32>
    %189 = arith.index_cast %c3_i32 : i32 to index
    %c0_55 = arith.constant 0 : index
    %c0_56 = arith.constant 0 : index
    %190 = vector.load %arg17[%189, %c0_55, %c0_56] : memref<8x2x128xf32, #tpu.memory_space<vmem>>, vector<1x2x128xf32>
    %191 = vector.shape_cast %190 : vector<1x2x128xf32> to vector<2x128xf32>
    %192 = vector.shape_cast %188 : vector<2x128xf32> to vector<1x2x128xf32>
    tpu.vector_store %arg17[%189, %c0_55, %c0_56], %192 {strides = array<i32>} : memref<8x2x128xf32, #tpu.memory_space<vmem>>, vector<1x2x128xf32>,
    %c4_i32 = arith.constant 4 : i32
    %193 = arith.index_cast %c4_i32 : i32 to index
    %c0_57 = arith.constant 0 : index
    %c0_58 = arith.constant 0 : index
    %194 = vector.load %arg16[%193, %c0_57, %c0_58] : memref<8x2x512xf32, #tpu.memory_space<vmem>>, vector<1x2x512xf32>
    %195 = vector.shape_cast %194 : vector<1x2x512xf32> to vector<2x512xf32>
    %cst_59 = arith.constant dense<0.000000e+00> : vector<2x384xf32>
    %196 = tpu.matmul %188, %12, %cst_59 {dimension_numbers = #tpu.dot_dimension_numbers<[1], [0], [0], [1], [0, 0, 1, 1], [], []>} : vector<2x128xf32>, vector<128x384xf32>, vector<2x384xf32> -> vector<2x384xf32>
    %197 = vector.extract_strided_slice %195 {offsets = [0, 0], sizes = [2, 128], strides = [1, 1]} : vector<2x512xf32> to vector<2x128xf32>
    %198 = vector.extract_strided_slice %195 {offsets = [0, 128], sizes = [2, 128], strides = [1, 1]} : vector<2x512xf32> to vector<2x128xf32>
    %199 = vector.extract_strided_slice %196 {offsets = [0, 0], sizes = [2, 128], strides = [1, 1]} : vector<2x384xf32> to vector<2x128xf32>
    %200 = arith.addf %198, %199 : vector<2x128xf32>
    %201 = vector.extract_strided_slice %195 {offsets = [0, 256], sizes = [2, 128], strides = [1, 1]} : vector<2x512xf32> to vector<2x128xf32>
    %202 = vector.extract_strided_slice %196 {offsets = [0, 128], sizes = [2, 128], strides = [1, 1]} : vector<2x384xf32> to vector<2x128xf32>
    %203 = arith.addf %201, %202 : vector<2x128xf32>
    %204 = vector.extract_strided_slice %195 {offsets = [0, 384], sizes = [2, 128], strides = [1, 1]} : vector<2x512xf32> to vector<2x128xf32>
    %205 = vector.extract_strided_slice %196 {offsets = [0, 256], sizes = [2, 128], strides = [1, 1]} : vector<2x384xf32> to vector<2x128xf32>
    %206 = arith.addf %204, %205 : vector<2x128xf32>
    %cst_60 = arith.constant 5.000000e-01 : f32
    %207 = vector.broadcast %cst_60 : f32 to vector<2x128xf32>
    %208 = arith.mulf %207, %206 : vector<2x128xf32>
    %209 = math.tanh %208 : vector<2x128xf32>
    %cst_61 = arith.constant 1.000000e+00 : f32
    %210 = vector.broadcast %cst_61 : f32 to vector<2x128xf32>
    %211 = arith.addf %210, %209 : vector<2x128xf32>
    %cst_62 = arith.constant 5.000000e-01 : f32
    %212 = vector.broadcast %cst_62 : f32 to vector<2x128xf32>
    %213 = arith.mulf %212, %211 : vector<2x128xf32>
    %214 = math.tanh %200 : vector<2x128xf32>
    %215 = arith.mulf %197, %214 : vector<2x128xf32>
    %cst_63 = arith.constant 0.000000e+00 : f32
    %216 = vector.broadcast %cst_63 : f32 to vector<2x128xf32>
    %217 = arith.subf %216, %213 : vector<2x128xf32>
    %218 = math.exp %217 : vector<2x128xf32>
    %219 = arith.mulf %176, %218 : vector<2x128xf32>
    %220 = arith.maximumf %219, %203 : vector<2x128xf32>
    %221 = arith.subf %176, %213 : vector<2x128xf32>
    %222 = arith.subf %221, %220 : vector<2x128xf32>
    %223 = math.exp %222 : vector<2x128xf32>
    %224 = arith.subf %203, %220 : vector<2x128xf32>
    %225 = math.exp %224 : vector<2x128xf32>
    %226 = arith.mulf %184, %223 : vector<2x128xf32>
    %227 = arith.mulf %215, %225 : vector<2x128xf32>
    %228 = arith.addf %226, %227 : vector<2x128xf32>
    %229 = arith.mulf %186, %223 : vector<2x128xf32>
    %230 = arith.addf %229, %225 : vector<2x128xf32>
    %231 = arith.divf %228, %230 : vector<2x128xf32>
    %232 = math.tanh %231 : vector<2x128xf32>
    %233 = arith.index_cast %c4_i32 : i32 to index
    %c0_64 = arith.constant 0 : index
    %c0_65 = arith.constant 0 : index
    %234 = vector.load %arg17[%233, %c0_64, %c0_65] : memref<8x2x128xf32, #tpu.memory_space<vmem>>, vector<1x2x128xf32>
    %235 = vector.shape_cast %234 : vector<1x2x128xf32> to vector<2x128xf32>
    %236 = vector.shape_cast %232 : vector<2x128xf32> to vector<1x2x128xf32>
    tpu.vector_store %arg17[%233, %c0_64, %c0_65], %236 {strides = array<i32>} : memref<8x2x128xf32, #tpu.memory_space<vmem>>, vector<1x2x128xf32>,
    %c5_i32 = arith.constant 5 : i32
    %237 = arith.index_cast %c5_i32 : i32 to index
    %c0_66 = arith.constant 0 : index
    %c0_67 = arith.constant 0 : index
    %238 = vector.load %arg16[%237, %c0_66, %c0_67] : memref<8x2x512xf32, #tpu.memory_space<vmem>>, vector<1x2x512xf32>
    %239 = vector.shape_cast %238 : vector<1x2x512xf32> to vector<2x512xf32>
    %cst_68 = arith.constant dense<0.000000e+00> : vector<2x384xf32>
    %240 = tpu.matmul %232, %12, %cst_68 {dimension_numbers = #tpu.dot_dimension_numbers<[1], [0], [0], [1], [0, 0, 1, 1], [], []>} : vector<2x128xf32>, vector<128x384xf32>, vector<2x384xf32> -> vector<2x384xf32>
    %241 = vector.extract_strided_slice %239 {offsets = [0, 0], sizes = [2, 128], strides = [1, 1]} : vector<2x512xf32> to vector<2x128xf32>
    %242 = vector.extract_strided_slice %239 {offsets = [0, 128], sizes = [2, 128], strides = [1, 1]} : vector<2x512xf32> to vector<2x128xf32>
    %243 = vector.extract_strided_slice %240 {offsets = [0, 0], sizes = [2, 128], strides = [1, 1]} : vector<2x384xf32> to vector<2x128xf32>
    %244 = arith.addf %242, %243 : vector<2x128xf32>
    %245 = vector.extract_strided_slice %239 {offsets = [0, 256], sizes = [2, 128], strides = [1, 1]} : vector<2x512xf32> to vector<2x128xf32>
    %246 = vector.extract_strided_slice %240 {offsets = [0, 128], sizes = [2, 128], strides = [1, 1]} : vector<2x384xf32> to vector<2x128xf32>
    %247 = arith.addf %245, %246 : vector<2x128xf32>
    %248 = vector.extract_strided_slice %239 {offsets = [0, 384], sizes = [2, 128], strides = [1, 1]} : vector<2x512xf32> to vector<2x128xf32>
    %249 = vector.extract_strided_slice %240 {offsets = [0, 256], sizes = [2, 128], strides = [1, 1]} : vector<2x384xf32> to vector<2x128xf32>
    %250 = arith.addf %248, %249 : vector<2x128xf32>
    %cst_69 = arith.constant 5.000000e-01 : f32
    %251 = vector.broadcast %cst_69 : f32 to vector<2x128xf32>
    %252 = arith.mulf %251, %250 : vector<2x128xf32>
    %253 = math.tanh %252 : vector<2x128xf32>
    %cst_70 = arith.constant 1.000000e+00 : f32
    %254 = vector.broadcast %cst_70 : f32 to vector<2x128xf32>
    %255 = arith.addf %254, %253 : vector<2x128xf32>
    %cst_71 = arith.constant 5.000000e-01 : f32
    %256 = vector.broadcast %cst_71 : f32 to vector<2x128xf32>
    %257 = arith.mulf %256, %255 : vector<2x128xf32>
    %258 = math.tanh %244 : vector<2x128xf32>
    %259 = arith.mulf %241, %258 : vector<2x128xf32>
    %cst_72 = arith.constant 0.000000e+00 : f32
    %260 = vector.broadcast %cst_72 : f32 to vector<2x128xf32>
    %261 = arith.subf %260, %257 : vector<2x128xf32>
    %262 = math.exp %261 : vector<2x128xf32>
    %263 = arith.mulf %220, %262 : vector<2x128xf32>
    %264 = arith.maximumf %263, %247 : vector<2x128xf32>
    %265 = arith.subf %220, %257 : vector<2x128xf32>
    %266 = arith.subf %265, %264 : vector<2x128xf32>
    %267 = math.exp %266 : vector<2x128xf32>
    %268 = arith.subf %247, %264 : vector<2x128xf32>
    %269 = math.exp %268 : vector<2x128xf32>
    %270 = arith.mulf %228, %267 : vector<2x128xf32>
    %271 = arith.mulf %259, %269 : vector<2x128xf32>
    %272 = arith.addf %270, %271 : vector<2x128xf32>
    %273 = arith.mulf %230, %267 : vector<2x128xf32>
    %274 = arith.addf %273, %269 : vector<2x128xf32>
    %275 = arith.divf %272, %274 : vector<2x128xf32>
    %276 = math.tanh %275 : vector<2x128xf32>
    %277 = arith.index_cast %c5_i32 : i32 to index
    %c0_73 = arith.constant 0 : index
    %c0_74 = arith.constant 0 : index
    %278 = vector.load %arg17[%277, %c0_73, %c0_74] : memref<8x2x128xf32, #tpu.memory_space<vmem>>, vector<1x2x128xf32>
    %279 = vector.shape_cast %278 : vector<1x2x128xf32> to vector<2x128xf32>
    %280 = vector.shape_cast %276 : vector<2x128xf32> to vector<1x2x128xf32>
    tpu.vector_store %arg17[%277, %c0_73, %c0_74], %280 {strides = array<i32>} : memref<8x2x128xf32, #tpu.memory_space<vmem>>, vector<1x2x128xf32>,
    %c6_i32 = arith.constant 6 : i32
    %281 = arith.index_cast %c6_i32 : i32 to index
    %c0_75 = arith.constant 0 : index
    %c0_76 = arith.constant 0 : index
    %282 = vector.load %arg16[%281, %c0_75, %c0_76] : memref<8x2x512xf32, #tpu.memory_space<vmem>>, vector<1x2x512xf32>
    %283 = vector.shape_cast %282 : vector<1x2x512xf32> to vector<2x512xf32>
    %cst_77 = arith.constant dense<0.000000e+00> : vector<2x384xf32>
    %284 = tpu.matmul %276, %12, %cst_77 {dimension_numbers = #tpu.dot_dimension_numbers<[1], [0], [0], [1], [0, 0, 1, 1], [], []>} : vector<2x128xf32>, vector<128x384xf32>, vector<2x384xf32> -> vector<2x384xf32>
    %285 = vector.extract_strided_slice %283 {offsets = [0, 0], sizes = [2, 128], strides = [1, 1]} : vector<2x512xf32> to vector<2x128xf32>
    %286 = vector.extract_strided_slice %283 {offsets = [0, 128], sizes = [2, 128], strides = [1, 1]} : vector<2x512xf32> to vector<2x128xf32>
    %287 = vector.extract_strided_slice %284 {offsets = [0, 0], sizes = [2, 128], strides = [1, 1]} : vector<2x384xf32> to vector<2x128xf32>
    %288 = arith.addf %286, %287 : vector<2x128xf32>
    %289 = vector.extract_strided_slice %283 {offsets = [0, 256], sizes = [2, 128], strides = [1, 1]} : vector<2x512xf32> to vector<2x128xf32>
    %290 = vector.extract_strided_slice %284 {offsets = [0, 128], sizes = [2, 128], strides = [1, 1]} : vector<2x384xf32> to vector<2x128xf32>
    %291 = arith.addf %289, %290 : vector<2x128xf32>
    %292 = vector.extract_strided_slice %283 {offsets = [0, 384], sizes = [2, 128], strides = [1, 1]} : vector<2x512xf32> to vector<2x128xf32>
    %293 = vector.extract_strided_slice %284 {offsets = [0, 256], sizes = [2, 128], strides = [1, 1]} : vector<2x384xf32> to vector<2x128xf32>
    %294 = arith.addf %292, %293 : vector<2x128xf32>
    %cst_78 = arith.constant 5.000000e-01 : f32
    %295 = vector.broadcast %cst_78 : f32 to vector<2x128xf32>
    %296 = arith.mulf %295, %294 : vector<2x128xf32>
    %297 = math.tanh %296 : vector<2x128xf32>
    %cst_79 = arith.constant 1.000000e+00 : f32
    %298 = vector.broadcast %cst_79 : f32 to vector<2x128xf32>
    %299 = arith.addf %298, %297 : vector<2x128xf32>
    %cst_80 = arith.constant 5.000000e-01 : f32
    %300 = vector.broadcast %cst_80 : f32 to vector<2x128xf32>
    %301 = arith.mulf %300, %299 : vector<2x128xf32>
    %302 = math.tanh %288 : vector<2x128xf32>
    %303 = arith.mulf %285, %302 : vector<2x128xf32>
    %cst_81 = arith.constant 0.000000e+00 : f32
    %304 = vector.broadcast %cst_81 : f32 to vector<2x128xf32>
    %305 = arith.subf %304, %301 : vector<2x128xf32>
    %306 = math.exp %305 : vector<2x128xf32>
    %307 = arith.mulf %264, %306 : vector<2x128xf32>
    %308 = arith.maximumf %307, %291 : vector<2x128xf32>
    %309 = arith.subf %264, %301 : vector<2x128xf32>
    %310 = arith.subf %309, %308 : vector<2x128xf32>
    %311 = math.exp %310 : vector<2x128xf32>
    %312 = arith.subf %291, %308 : vector<2x128xf32>
    %313 = math.exp %312 : vector<2x128xf32>
    %314 = arith.mulf %272, %311 : vector<2x128xf32>
    %315 = arith.mulf %303, %313 : vector<2x128xf32>
    %316 = arith.addf %314, %315 : vector<2x128xf32>
    %317 = arith.mulf %274, %311 : vector<2x128xf32>
    %318 = arith.addf %317, %313 : vector<2x128xf32>
    %319 = arith.divf %316, %318 : vector<2x128xf32>
    %320 = math.tanh %319 : vector<2x128xf32>
    %321 = arith.index_cast %c6_i32 : i32 to index
    %c0_82 = arith.constant 0 : index
    %c0_83 = arith.constant 0 : index
    %322 = vector.load %arg17[%321, %c0_82, %c0_83] : memref<8x2x128xf32, #tpu.memory_space<vmem>>, vector<1x2x128xf32>
    %323 = vector.shape_cast %322 : vector<1x2x128xf32> to vector<2x128xf32>
    %324 = vector.shape_cast %320 : vector<2x128xf32> to vector<1x2x128xf32>
    tpu.vector_store %arg17[%321, %c0_82, %c0_83], %324 {strides = array<i32>} : memref<8x2x128xf32, #tpu.memory_space<vmem>>, vector<1x2x128xf32>,
    %c7_i32 = arith.constant 7 : i32
    %325 = arith.index_cast %c7_i32 : i32 to index
    %c0_84 = arith.constant 0 : index
    %c0_85 = arith.constant 0 : index
    %326 = vector.load %arg16[%325, %c0_84, %c0_85] : memref<8x2x512xf32, #tpu.memory_space<vmem>>, vector<1x2x512xf32>
    %327 = vector.shape_cast %326 : vector<1x2x512xf32> to vector<2x512xf32>
    %cst_86 = arith.constant dense<0.000000e+00> : vector<2x384xf32>
    %328 = tpu.matmul %320, %12, %cst_86 {dimension_numbers = #tpu.dot_dimension_numbers<[1], [0], [0], [1], [0, 0, 1, 1], [], []>} : vector<2x128xf32>, vector<128x384xf32>, vector<2x384xf32> -> vector<2x384xf32>
    %329 = vector.extract_strided_slice %327 {offsets = [0, 0], sizes = [2, 128], strides = [1, 1]} : vector<2x512xf32> to vector<2x128xf32>
    %330 = vector.extract_strided_slice %327 {offsets = [0, 128], sizes = [2, 128], strides = [1, 1]} : vector<2x512xf32> to vector<2x128xf32>
    %331 = vector.extract_strided_slice %328 {offsets = [0, 0], sizes = [2, 128], strides = [1, 1]} : vector<2x384xf32> to vector<2x128xf32>
    %332 = arith.addf %330, %331 : vector<2x128xf32>
    %333 = vector.extract_strided_slice %327 {offsets = [0, 256], sizes = [2, 128], strides = [1, 1]} : vector<2x512xf32> to vector<2x128xf32>
    %334 = vector.extract_strided_slice %328 {offsets = [0, 128], sizes = [2, 128], strides = [1, 1]} : vector<2x384xf32> to vector<2x128xf32>
    %335 = arith.addf %333, %334 : vector<2x128xf32>
    %336 = vector.extract_strided_slice %327 {offsets = [0, 384], sizes = [2, 128], strides = [1, 1]} : vector<2x512xf32> to vector<2x128xf32>
    %337 = vector.extract_strided_slice %328 {offsets = [0, 256], sizes = [2, 128], strides = [1, 1]} : vector<2x384xf32> to vector<2x128xf32>
    %338 = arith.addf %336, %337 : vector<2x128xf32>
    %cst_87 = arith.constant 5.000000e-01 : f32
    %339 = vector.broadcast %cst_87 : f32 to vector<2x128xf32>
    %340 = arith.mulf %339, %338 : vector<2x128xf32>
    %341 = math.tanh %340 : vector<2x128xf32>
    %cst_88 = arith.constant 1.000000e+00 : f32
    %342 = vector.broadcast %cst_88 : f32 to vector<2x128xf32>
    %343 = arith.addf %342, %341 : vector<2x128xf32>
    %cst_89 = arith.constant 5.000000e-01 : f32
    %344 = vector.broadcast %cst_89 : f32 to vector<2x128xf32>
    %345 = arith.mulf %344, %343 : vector<2x128xf32>
    %346 = math.tanh %332 : vector<2x128xf32>
    %347 = arith.mulf %329, %346 : vector<2x128xf32>
    %cst_90 = arith.constant 0.000000e+00 : f32
    %348 = vector.broadcast %cst_90 : f32 to vector<2x128xf32>
    %349 = arith.subf %348, %345 : vector<2x128xf32>
    %350 = math.exp %349 : vector<2x128xf32>
    %351 = arith.mulf %308, %350 : vector<2x128xf32>
    %352 = arith.maximumf %351, %335 : vector<2x128xf32>
    %353 = arith.subf %308, %345 : vector<2x128xf32>
    %354 = arith.subf %353, %352 : vector<2x128xf32>
    %355 = math.exp %354 : vector<2x128xf32>
    %356 = arith.subf %335, %352 : vector<2x128xf32>
    %357 = math.exp %356 : vector<2x128xf32>
    %358 = arith.mulf %316, %355 : vector<2x128xf32>
    %359 = arith.mulf %347, %357 : vector<2x128xf32>
    %360 = arith.addf %358, %359 : vector<2x128xf32>
    %361 = arith.mulf %318, %355 : vector<2x128xf32>
    %362 = arith.addf %361, %357 : vector<2x128xf32>
    %363 = arith.divf %360, %362 : vector<2x128xf32>
    %364 = math.tanh %363 : vector<2x128xf32>
    %365 = arith.index_cast %c7_i32 : i32 to index
    %c0_91 = arith.constant 0 : index
    %c0_92 = arith.constant 0 : index
    %366 = vector.load %arg17[%365, %c0_91, %c0_92] : memref<8x2x128xf32, #tpu.memory_space<vmem>>, vector<1x2x128xf32>
    %367 = vector.shape_cast %366 : vector<1x2x128xf32> to vector<2x128xf32>
    %368 = vector.shape_cast %364 : vector<2x128xf32> to vector<1x2x128xf32>
    tpu.vector_store %arg17[%365, %c0_91, %c0_92], %368 {strides = array<i32>} : memref<8x2x128xf32, #tpu.memory_space<vmem>>, vector<1x2x128xf32>,
    %c8_i32 = arith.constant 8 : i32
    %c0_93 = arith.constant 0 : index
    %c0_94 = arith.constant 0 : index
    %369 = vector.load %arg12[%c0_93, %c0_94] : memref<2x128xf32, #tpu.memory_space<vmem>>, vector<2x128xf32>
    tpu.vector_store %arg12[%c0_93, %c0_94], %360 {strides = array<i32>} : memref<2x128xf32, #tpu.memory_space<vmem>>, vector<2x128xf32>,
    %c0_95 = arith.constant 0 : index
    %c0_96 = arith.constant 0 : index
    %370 = vector.load %arg13[%c0_95, %c0_96] : memref<2x128xf32, #tpu.memory_space<vmem>>, vector<2x128xf32>
    tpu.vector_store %arg13[%c0_95, %c0_96], %362 {strides = array<i32>} : memref<2x128xf32, #tpu.memory_space<vmem>>, vector<2x128xf32>,
    %c0_97 = arith.constant 0 : index
    %c0_98 = arith.constant 0 : index
    %371 = vector.load %arg14[%c0_97, %c0_98] : memref<2x128xf32, #tpu.memory_space<vmem>>, vector<2x128xf32>
    tpu.vector_store %arg14[%c0_97, %c0_98], %364 {strides = array<i32>} : memref<2x128xf32, #tpu.memory_space<vmem>>, vector<2x128xf32>,
    %c0_99 = arith.constant 0 : index
    %c0_100 = arith.constant 0 : index
    %372 = vector.load %arg15[%c0_99, %c0_100] : memref<2x128xf32, #tpu.memory_space<vmem>>, vector<2x128xf32>
    tpu.vector_store %arg15[%c0_99, %c0_100], %352 {strides = array<i32>} : memref<2x128xf32, #tpu.memory_space<vmem>>, vector<2x128xf32>,
    %c0_101 = arith.constant 0 : index
    %c0_102 = arith.constant 0 : index
    %c0_103 = arith.constant 0 : index
    %373 = vector.load %arg17[%c0_101, %c0_102, %c0_103] : memref<8x2x128xf32, #tpu.memory_space<vmem>>, vector<8x2x128xf32>
    %374 = vector.shape_cast %373 : vector<8x2x128xf32> to vector<16x128xf32>
    %c0_104 = arith.constant 0 : index
    %c0_105 = arith.constant 0 : index
    %375 = vector.load %arg9[%c0_104, %c0_105] : memref<128x128xf32, #tpu.memory_space<vmem>>, vector<128x128xf32>
    %cst_106 = arith.constant dense<0.000000e+00> : vector<16x128xf32>
    %376 = tpu.matmul %374, %375, %cst_106 {dimension_numbers = #tpu.dot_dimension_numbers<[1], [0], [0], [1], [0, 0, 1, 1], [], []>} : vector<16x128xf32>, vector<128x128xf32>, vector<16x128xf32> -> vector<16x128xf32>
    %c0_107 = arith.constant 0 : index
    %c0_108 = arith.constant 0 : index
    %377 = vector.load %arg10[%c0_107, %c0_108] : memref<1x128xf32, #tpu.memory_space<vmem>>, vector<1x128xf32>
    %378 = vector.broadcast %377 : vector<1x128xf32> to vector<16x128xf32>
    %379 = arith.addf %376, %378 : vector<16x128xf32>
    %380 = vector.shape_cast %379 : vector<16x128xf32> to vector<8x2x128xf32>
    %c0_109 = arith.constant 0 : index
    %c0_110 = arith.constant 0 : index
    %c0_111 = arith.constant 0 : index
    %381 = vector.load %arg11[%c0_109, %c0_110, %c0_111] : memref<8x2x128xf32, #tpu.memory_space<vmem>>, vector<8x2x128xf32>
    tpu.vector_store %arg11[%c0_109, %c0_110, %c0_111], %380 {strides = array<i32>} : memref<8x2x128xf32, #tpu.memory_space<vmem>>, vector<8x2x128xf32>,
    return
  }
  func.func @transform_0(%arg0: i32) -> (i32, i32, i32) {
    %c0_i32 = arith.constant 0 : i32
    %c0_i32_0 = arith.constant 0 : i32
    %c0_i32_1 = arith.constant 0 : i32
    return %arg0, %c0_i32, %c0_i32_0 : i32, i32, i32
  }
  func.func @transform_1(%arg0: i32) -> (i32, i32) {
    %c0_i32 = arith.constant 0 : i32
    %c0_i32_0 = arith.constant 0 : i32
    %c0_i32_1 = arith.constant 0 : i32
    return %c0_i32, %c0_i32_0 : i32, i32
  }
  func.func @transform_2(%arg0: i32) -> (i32, i32) {
    %c0_i32 = arith.constant 0 : i32
    %c0_i32_0 = arith.constant 0 : i32
    %c0_i32_1 = arith.constant 0 : i32
    return %c0_i32, %c0_i32_0 : i32, i32
  }
  func.func @transform_3(%arg0: i32) -> (i32, i32) {
    %c0_i32 = arith.constant 0 : i32
    %c0_i32_0 = arith.constant 0 : i32
    %c0_i32_1 = arith.constant 0 : i32
    return %c0_i32, %c0_i32_0 : i32, i32
  }
  func.func @transform_4(%arg0: i32) -> (i32, i32) {
    %c0_i32 = arith.constant 0 : i32
    %c0_i32_0 = arith.constant 0 : i32
    %c0_i32_1 = arith.constant 0 : i32
    return %c0_i32, %c0_i32_0 : i32, i32
  }
  func.func @transform_5(%arg0: i32) -> (i32, i32) {
    %c0_i32 = arith.constant 0 : i32
    %c0_i32_0 = arith.constant 0 : i32
    %c0_i32_1 = arith.constant 0 : i32
    return %c0_i32, %c0_i32_0 : i32, i32
  }
  func.func @transform_6(%arg0: i32) -> (i32, i32) {
    %c0_i32 = arith.constant 0 : i32
    %c0_i32_0 = arith.constant 0 : i32
    %c0_i32_1 = arith.constant 0 : i32
    return %c0_i32, %c0_i32_0 : i32, i32
  }
  func.func @transform_7(%arg0: i32) -> (i32, i32) {
    %c0_i32 = arith.constant 0 : i32
    %c0_i32_0 = arith.constant 0 : i32
    %c0_i32_1 = arith.constant 0 : i32
    return %c0_i32, %c0_i32_0 : i32, i32
  }
  func.func @transform_8(%arg0: i32) -> (i32, i32) {
    %c0_i32 = arith.constant 0 : i32
    %c0_i32_0 = arith.constant 0 : i32
    %c0_i32_1 = arith.constant 0 : i32
    return %c0_i32, %c0_i32_0 : i32, i32
  }
  func.func @transform_9(%arg0: i32) -> (i32, i32) {
    %c0_i32 = arith.constant 0 : i32
    %c0_i32_0 = arith.constant 0 : i32
    %c0_i32_1 = arith.constant 0 : i32
    return %c0_i32, %c0_i32_0 : i32, i32
  }
  func.func @transform_10(%arg0: i32) -> (i32, i32, i32) {
    %c0_i32 = arith.constant 0 : i32
    %c0_i32_0 = arith.constant 0 : i32
    %c0_i32_1 = arith.constant 0 : i32
    return %arg0, %c0_i32, %c0_i32_0 : i32, i32, i32
  }
  func.func @transform_11(%arg0: i32) -> (i32, i32) {
    %c0_i32 = arith.constant 0 : i32
    %c0_i32_0 = arith.constant 0 : i32
    %c0_i32_1 = arith.constant 0 : i32
    return %c0_i32, %c0_i32_0 : i32, i32
  }
  func.func @transform_12(%arg0: i32) -> (i32, i32) {
    %c0_i32 = arith.constant 0 : i32
    %c0_i32_0 = arith.constant 0 : i32
    %c0_i32_1 = arith.constant 0 : i32
    return %c0_i32, %c0_i32_0 : i32, i32
  }
  func.func @transform_13(%arg0: i32) -> (i32, i32) {
    %c0_i32 = arith.constant 0 : i32
    %c0_i32_0 = arith.constant 0 : i32
    %c0_i32_1 = arith.constant 0 : i32
    return %c0_i32, %c0_i32_0 : i32, i32
  }
  func.func @transform_14(%arg0: i32) -> (i32, i32) {
    %c0_i32 = arith.constant 0 : i32
    %c0_i32_0 = arith.constant 0 : i32
    %c0_i32_1 = arith.constant 0 : i32
    return %c0_i32, %c0_i32_0 : i32, i32
  }
}

</mosaic_0001>

<bundles_post_ra>
// kernel: rwa_forward.1
= control target key start
LH: loop header
LB: loop body
LE: loop exit
PB: predicated region body
PF: predicated region fallthrough
CT: control target
= control target key end

     0   :  { %20 = vsyncpa [#allocation5], 0  ;;  %s2947_s0 = inlined_call_operand.vmem [shape: f32[8,2,4], index: 0, kind: input, shape index: {}]   ;;  %s2948_s1 = inlined_call_operand.vmem [shape: f32[2,128], index: 1, kind: input, shape index: {}]   ;;  %s2949_s2 = inlined_call_operand.vmem [shape: f32[2,128], index: 2, kind: input, shape index: {}]   ;;  %s2950_s3 = inlined_call_operand.vmem [shape: f32[2,128], index: 3, kind: input, shape index: {}]   ;;  %s2951_s4 = inlined_call_operand.vmem [shape: f32[2,128], index: 4, kind: input, shape index: {}]   ;;  %s2952_s5 = inlined_call_operand.vmem [shape: f32[4,512], index: 5, kind: input, shape index: {}]   ;;  %s2953_s6 = inlined_call_operand.vmem [shape: f32[128,384], index: 6, kind: input, shape index: {}]   ;;  %s2954_s7 = inlined_call_operand.vmem [shape: f32[1,512], index: 7, kind: input, shape index: {}]   ;;  %s2955_s8 = inlined_call_operand.vmem [shape: f32[128,128], index: 8, kind: input, shape index: {}]   ;;  %s2956_s9 = inlined_call_operand.vmem [shape: f32[1,128], index: 9, kind: input, shape index: {}]   ;;  %s2957_s10 = inlined_call_operand.vmem [shape: f32[8,2,128], index: 10, kind: output, shape index: {0}]   ;;  %s2958_s11 = inlined_call_operand.hbm [shape: f32[2,128], index: 11, kind: output, shape index: {1}]   ;;  %s2959_s12 = inlined_call_operand.hbm [shape: f32[2,128], index: 12, kind: output, shape index: {2}]   ;;  %s2960_s13 = inlined_call_operand.hbm [shape: f32[2,128], index: 13, kind: output, shape index: {3}]   ;;  %s2961_s14 = inlined_call_operand.hbm [shape: f32[2,128], index: 14, kind: output, shape index: {4}]  }
   0x1   :  { %21 = vsyncpa [#allocation7], 0  ;;  %v1766_v0 = vld [vmem:[%s2953_s6 + $0x168] sm:$0xff]  ;;  %v1771_v1 = vld [vmem:[%s2953_s6 + $0x150] sm:$0xff]  ;;  %vm114_vm0 = vcmask 1043456   ;;  %vm109_vm1 = vcmask 31744  }
   0x2   :  { %333 = vmatpush.msra.mxu1 %v1766_v0  ;;  %v1777_v2 = vld [vmem:[%s2953_s6 + $0x138] sm:$0xff]  ;;  %v55_v3 = vld [vmem:[%s2947_s0] sm:$0x3]  ;;  %v56_v4 = vld [vmem:[%s2947_s0 + $0x2] sm:$0x3] }
   0x3   :  { %v57_v5 = vld [vmem:[%s2947_s0 + $0x4] sm:$0x3]  ;;  %v58_v7 = vld [vmem:[%s2947_s0 + $0x6] sm:$0x3]  ;;  %83 = vst [vmem:[#allocation1] ss:$4 sm:$0xff] %v55_v3 }
   0x4   :  { %334 = vmatpush.msra.mxu1 %v1771_v1  ;;  %v1792_v6 = vld [vmem:[%s2953_s6 + $0x120] sm:$0xff]  ;;  %85 = vst [vmem:[#allocation1 + $0x1] ss:$4 sm:$0xff] %v56_v4  ;;  %v64_v8 = vld [vmem:[%s2952_s5 + $0x8] sm:$0xff]  ;;  %v1810_v10 = vld [vmem:[%s2953_s6 + $0xf0] sm:$0xff] }
   0x5   :  { %v1804_v9 = vld [vmem:[%s2953_s6 + $0x108] sm:$0xff]  ;;  %87 = vst [vmem:[#allocation1 + $0x2] ss:$4 sm:$0xff] %v57_v5  ;;  %v1828_v15 = vld [vmem:[%s2953_s6 + $0xd8] sm:$0xff]  ;;  %v1834_v16 = vld [vmem:[%s2953_s6 + $0xc0] sm:$0xff] }
   0x6   :  { %335 = vmatpush.msra.mxu1 %v1777_v2  ;;  %89 = vst [vmem:[#allocation1 + $0x3] ss:$4 sm:$0xff] %v58_v7  ;;  %v59_v11 = vld [vmem:[%s2947_s0 + $0x8] sm:$0x3]  ;;  %v60_v12 = vld [vmem:[%s2947_s0 + $0xa] sm:$0x3] }
   0x7   :  { %104 = vst [vmem:[#allocation1 + $0x10] ss:$2 sm:$0xff] %v64_v8  ;;  %v61_v13 = vld [vmem:[%s2947_s0 + $0xc] sm:$0x3]  ;;  %v62_v14 = vld [vmem:[%s2947_s0 + $0xe] sm:$0x3] }
   0x8   :  { %336 = vmatpush.msra.mxu1 %v1792_v6  ;;  %91 = vst [vmem:[#allocation1 + $0x20] ss:$4 sm:$0xff] %v59_v11  ;;  %v63_v17 = vld [vmem:[%s2952_s5] sm:$0xff]  ;;  %v1845_v19 = vld [vmem:[%s2953_s6 + $0xa8] sm:$0xff]  ;;  %v1851_v20 = vld [vmem:[%s2953_s6 + $0x90] sm:$0xff] }
   0x9   :  { %93 = vst [vmem:[#allocation1 + $0x21] ss:$4 sm:$0xff] %v60_v12  ;;  %v51_v22 = vld [vmem:[%s2950_s3] sm:$0x3]  ;;  %v1861_v23 = vld [vmem:[%s2953_s6 + $0x78] sm:$0xff] }
   0xa   :  { %337 = vmatpush.msra.mxu1 %v1804_v9  ;;  %95 = vst [vmem:[#allocation1 + $0x22] ss:$4 sm:$0xff] %v61_v13 }
   0xb   :  { %97 = vst [vmem:[#allocation1 + $0x23] ss:$4 sm:$0xff] %v62_v14 }
   0xc   :  { %338 = vmatpush.msra.mxu1 %v1810_v10  ;;  %52 = vst [vmem:[#allocation8] sm:$0x3] %v51_v22 }
   0xd   :  { %v1840_v18 = vld.sshfl [vmem:[#allocation1] sm:$0xff pattern:$0x73625140] }
   0xe   :  { %339 = vmatpush.msra.mxu1 %v1828_v15  ;;  %102 = vst [vmem:[#allocation1] ss:$2 sm:$0xff] %v63_v17  ;;  %v108_v21 = vld.sshfl [vmem:[#allocation1 + $0x18] sm:$0xff pattern:$0x75316420] }
   0xf   :  { %1414 = vmatpush.msk.msra.mxu3 %vm114_vm0, %v108_v21 }
  0x10   :  { %340 = vmatpush.msra.mxu1 %v1834_v16  ;;  %1415 = vmatmul.msk.f32.vlgmr.msra.gmra.mxu3 %vm109_vm1, %v1840_v18 }
  0x12   :  { %341 = vmatpush.msra.mxu1 %v1845_v19 }
  0x13   :  { %22 = vsyncpa [#allocation10], 0  ;;  %445 = vmatpush.msrb.mxu3 %v1766_v0  ;;  %v1870_v24 = vld [vmem:[%s2953_s6 + $0x60] sm:$0xff]  ;;  %v107_v25 = vld.sshfl [vmem:[#allocation1 + $0x10] sm:$0xff pattern:$0x75316420] }
  0x14   :  { %342 = vmatpush.msra.mxu1 %v1851_v20  ;;  %v1876_v26 = vld [vmem:[%s2953_s6 + $0x48] sm:$0xff]  ;;  %v1883_v29 = vld [vmem:[%s2953_s6 + $0x178] sm:$0xff]  ;;  %v1892_v30 = vld [vmem:[%s2953_s6 + $0x30] sm:$0xff]  ;;  %vm231_vm2 = vcmask 1045508   ;;  %vm234_vm3 = vcmask 1043458   ;;  %vm236_vm4 = vcmask 1045504  }
  0x15   :  { %2989 = vst [vmem:[#allocation14_spill] sm:$0xff] %v1876_v26  ;;  %446 = vmatpush.msrb.mxu3 %v1771_v1  ;;  %v106_v27 = vld.sshfl [vmem:[#allocation1 + $0x8] sm:$0xff pattern:$0x75316420]  ;;  %v1898_v31 = vld [vmem:[%s2953_s6 + $0x160] sm:$0xff]  ;;  %v1909_v33 = vld [vmem:[%s2953_s6 + $0x18] sm:$0xff] }
  0x16   :  { %343 = vmatpush.msra.mxu1 %v1861_v23  ;;  %v105_v28 = vld.sshfl [vmem:[#allocation1] sm:$0xff pattern:$0x75316420]  ;;  %1408 = vmatpush.msk.msra.mxu2 %vm114_vm0, %v106_v27  ;;  %2990 = vst [vmem:[#allocation15_spill] sm:$0xff] %v1892_v30  ;;  %v1914_v34 = vld [vmem:[%s2953_s6 + $0x148] sm:$0xff]  ;;  %v1920_v35 = vld [vmem:[%s2953_s6 + $0x170] sm:$0xff] }
  0x17   :  { %1409 = vmatmul.msk.f32.vlgmr.msra.gmra.mxu2 %vm109_vm1, %v1840_v18  ;;  %1405 = vmatpush.msk.msra.mxu0 %vm114_vm0, %v105_v28  ;;  %v1904_v32 = vld.sshfl [vmem:[#allocation1 + $0x20] sm:$0xff pattern:$0x73625140]  ;;  %2991 = vst [vmem:[#allocation16_spill] sm:$0xff] %v1909_v33  ;;  %v1934_v37 = vld [vmem:[%s2953_s6 + $0x130] sm:$0xff]  ;;  %v1940_v38 = vld [vmem:[%s2953_s6 + $0x158] sm:$0xff] }
  0x18   :  { %344 = vmatpush.msra.mxu1 %v1870_v24  ;;  %1411 = vmatpush.msk.msrb.mxu2 %vm114_vm0, %v107_v25  ;;  %v1928_v36 = vld [vmem:[%s2953_s6] sm:$0xff]  ;;  %v1944_v39 = vld [vmem:[#allocation8] sm:$0x3]  ;;  %v1975_v43 = vld [vmem:[%s2953_s6 + $0xe8] sm:$0xff]  ;;  %vm229_vm5 = vcmask 1041408   ;;  %vm238_vm6 = vcmask 1045506  }
  0x19   :  { %1406 = vmatmul.msk.f32.vlgmr.msra.gmra.mxu0 %vm109_vm1, %v1840_v18  ;;  %1416 = vmatmul.msk.f32.gmra.mxu3 %vm109_vm1, %v1904_v32  ;;  %2992 = vst [vmem:[#allocation17_spill] sm:$0xff] %v1928_v36  ;;  %v1950_v40 = vld [vmem:[%s2953_s6 + $0x118] sm:$0xff]  ;;  %v1961_v41 = vld [vmem:[%s2953_s6 + $0x100] sm:$0xff]  ;;  %v1983_v44 = vld [vmem:[%s2953_s6 + $0x128] sm:$0xff]  ;;  %s1347_s27 = sshll.u32 %s2958_s11, 4  ;;  %s1686_s29 = smov [#allocation8]   ;;  %s1348_s27 = int_to_ptr.hbm [resolvable:$true] %s1347_s27 }
  0x1a   :  { %345 = vmatpush.msra.mxu1 %v1876_v26  ;;  %373 = vmatpush.msra.mxu2 %v1883_v29  ;;  %v1970_v42 = vld [vmem:[%s2953_s6 + $0x140] sm:$0xff]  ;;  %v1989_v45 = vld [vmem:[%s2953_s6 + $0xd0] sm:$0xff]  ;;  %v2003_v47 = vld [vmem:[%s2953_s6 + $0xb8] sm:$0xff]  ;;  %s1367_s30 = sshll.u32 %s1686_s29, 4  ;;  %s1369_s0 = sshll.u32 %s2960_s13, 4  ;;  %s1368_s30 = int_to_ptr.vmem [resolvable:$true] %s1367_s30  ;;  %s1370_s0 = int_to_ptr.hbm [resolvable:$true] %s1369_s0 }
  0x1b   :  { %465 = vmatpush.msrb.mxu0 %v1920_v35  ;;  %447 = vmatpush.msrb.mxu3 %v1777_v2  ;;  %v1997_v46 = vld [vmem:[%s2953_s6 + $0x110] sm:$0xff]  ;;  %v2011_v48 = vld [vmem:[%s2953_s6 + $0xf8] sm:$0xff]  ;;  %v2019_v49 = vld [vmem:[%s2953_s6 + $0xa0] sm:$0xff]  ;;  %s1687_s18 = smov [#allocation9]  }
  0x1c   :  { %346 = vmatpush.msra.mxu1 %v1892_v30  ;;  %374 = vmatpush.msra.mxu2 %v1898_v31  ;;  %v2026_v50 = vld [vmem:[%s2953_s6 + $0xe0] sm:$0xff]  ;;  %v2032_v51 = vld [vmem:[%s2953_s6 + $0x88] sm:$0xff]  ;;  %v2046_v53 = vld [vmem:[%s2953_s6 + $0x70] sm:$0xff]  ;;  %s1378_s11 = sshll.u32 %s1687_s18, 4  ;;  %s1379_s11 = int_to_ptr.vmem [resolvable:$true] %s1378_s11 }
  0x1d   :  { %466 = vmatpush.msrb.mxu0 %v1940_v38  ;;  %448 = vmatpush.msrb.mxu3 %v1792_v6  ;;  %v2040_v52 = vld [vmem:[%s2953_s6 + $0xc8] sm:$0xff]  ;;  %v2054_v54 = vld [vmem:[%s2953_s6 + $0xb0] sm:$0xff]  ;;  %v2060_v55 = vld [vmem:[%s2953_s6 + $0x58] sm:$0xff] }
  0x1e   :  { %347 = vmatpush.msra.mxu1 %v1909_v33  ;;  %375 = vmatpush.msra.mxu2 %v1914_v34  ;;  %2993 = vst [vmem:[#allocation18_spill] sm:$0xff] %v2060_v55  ;;  %v2068_v56 = vld [vmem:[%s2953_s6 + $0x98] sm:$0xff]  ;;  %v2076_v57 = vld [vmem:[%s2953_s6 + $0x40] sm:$0xff]  ;;  %v2089_v59 = vld [vmem:[%s2953_s6 + $0x28] sm:$0xff] }
  0x1f   :  { %1410 = vmatmul.msk.f32.gmra.mxu2 %vm109_vm1, %v1904_v32  ;;  %467 = vmatpush.msrb.mxu0 %v1970_v42  ;;  %2994 = vst [vmem:[#allocation19_spill] sm:$0xff] %v2076_v57  ;;  %v2083_v58 = vld [vmem:[%s2953_s6 + $0x80] sm:$0xff]  ;;  %v2097_v60 = vld [vmem:[%s2953_s6 + $0x68] sm:$0xff]  ;;  %v2103_v61 = vld [vmem:[%s2953_s6 + $0x10] sm:$0xff] }
  0x20   :  { %348 = vmatpush.msra.mxu1 %v1928_v36  ;;  %376 = vmatpush.msra.mxu2 %v1934_v37  ;;  %2995 = vst [vmem:[#allocation20_spill] sm:$0xff] %v2089_v59  ;;  %v2111_v62 = vld [vmem:[%s2953_s6 + $0x50] sm:$0xff]  ;;  %v2120_v63 = vld [vmem:[%s2953_s6 + $0x38] sm:$0xff]  ;;  %v2128_v3 = vld [vmem:[%s2953_s6 + $0x20] sm:$0xff] }
  0x21   :  { %349 = vmatmul.f32.vlgmr.msra.gmra.mxu1 %v1944_v39  ;;  %1407 = vmatmul.msk.f32.gmra.mxu0 %vm109_vm1, %v1904_v32  ;;  %2996 = vst [vmem:[#allocation21_spill] sm:$0xff] %v2097_v60  ;;  %v2137_v4 = vld [vmem:[%s2953_s6 + $0x8] sm:$0xff]  ;;  %v65_v5 = vld [vmem:[%s2954_s7] sm:$0xf] }
  0x22   :  { %353 = vmatpush.msrb.mxu1 %v1920_v35  ;;  %377 = vmatpush.msra.mxu2 %v1950_v40  ;;  %2997 = vst [vmem:[#allocation22_spill] sm:$0xff] %v2103_v61  ;;  %v68_v7 = vperm.slane %v65_v5, 1  ;;  %v67_v8 = vperm.slane %v65_v5, 0 }
  0x23   :  { %449 = vmatpush.msrb.mxu3 %v1804_v9  ;;  %468 = vmatpush.msrb.mxu0 %v1983_v44  ;;  %2998 = vst [vmem:[#allocation23_spill] sm:$0xff] %v2111_v62 }
  0x24   :  { %354 = vmatpush.msrb.mxu1 %v1940_v38  ;;  %378 = vmatpush.msra.mxu2 %v1961_v41  ;;  %2999 = vst [vmem:[#allocation24_spill] sm:$0xff] %v2120_v63 }
  0x25   :  { %450 = vmatpush.msrb.mxu3 %v1810_v10  ;;  %469 = vmatpush.msrb.mxu0 %v1997_v46  ;;  %3000 = vst [vmem:[#allocation25_spill] sm:$0xff] %v2128_v3 }
  0x26   :  { %355 = vmatpush.msrb.mxu1 %v1970_v42  ;;  %379 = vmatpush.msra.mxu2 %v1975_v43  ;;  %3001 = vst [vmem:[#allocation26_spill] sm:$0xff] %v2137_v4 }
  0x27   :  { %451 = vmatpush.msrb.mxu3 %v1828_v15  ;;  %1412 = vmatmul.msk.f32.vlgmr.msrb.gmra.mxu2 %vm109_vm1, %v1840_v18  ;;  %v53_v18 = vld [vmem:[%s2951_s4] sm:$0x3]  ;;  %s1684_s4 = smov [#allocation6]  }
  0x28   :  { %356 = vmatpush.msrb.mxu1 %v1983_v44  ;;  %380 = vmatpush.msra.mxu2 %v1989_v45  ;;  %54 = vst [vmem:[#allocation9] sm:$0x3] %v53_v18  ;;  %s1356_s7 = sshll.u32 %s1684_s4, 4  ;;  %s1357_s7 = int_to_ptr.vmem [resolvable:$true] %s1356_s7 }
  0x29   :  { %470 = vmatpush.msrb.mxu0 %v2011_v48  ;;  %452 = vmatpush.msrb.mxu3 %v1834_v16 }
  0x2a   :  { %357 = vmatpush.msrb.mxu1 %v1997_v46  ;;  %381 = vmatpush.msra.mxu2 %v2003_v47 }
  0x2b   :  { %471 = vmatpush.msrb.mxu0 %v2026_v50  ;;  %453 = vmatpush.msrb.mxu3 %v1845_v19 }
  0x2c   :  { %358 = vmatpush.msrb.mxu1 %v2011_v48  ;;  %382 = vmatpush.msra.mxu2 %v2019_v49 }
  0x2d   :  { %472 = vmatpush.msrb.mxu0 %v2040_v52  ;;  %454 = vmatpush.msrb.mxu3 %v1851_v20 }
  0x2e   :  { %359 = vmatpush.msrb.mxu1 %v2026_v50  ;;  %383 = vmatpush.msra.mxu2 %v2032_v51 }
  0x2f   :  { %473 = vmatpush.msrb.mxu0 %v2054_v54  ;;  %1413 = vmatmul.msk.f32.gmra.mxu2 %vm109_vm1, %v1904_v32  ;;  %v70_v32 = vperm.slane %v65_v5, 3 }
  0x30   :  { %360 = vmatpush.msrb.mxu1 %v2040_v52  ;;  %384 = vmatpush.msra.mxu2 %v2046_v53 }
  0x31   :  { %474 = vmatpush.msrb.mxu0 %v2068_v56  ;;  %455 = vmatpush.msrb.mxu3 %v1861_v23 }
  0x32   :  { %361 = vmatpush.msrb.mxu1 %v2054_v54  ;;  %385 = vmatpush.msra.mxu2 %v2060_v55 }
  0x33   :  { %475 = vmatpush.msrb.mxu0 %v2083_v58  ;;  %456 = vmatpush.msrb.mxu3 %v1870_v24 }
  0x34   :  { %362 = vmatpush.msrb.mxu1 %v2068_v56  ;;  %386 = vmatpush.msra.mxu2 %v2076_v57 }
  0x35   :  { %476 = vmatpush.msrb.mxu0 %v2097_v60  ;;  %457 = vmatpush.msrb.mxu3 %v1876_v26 }
  0x36   :  { %363 = vmatpush.msrb.mxu1 %v2083_v58  ;;  %387 = vmatpush.msra.mxu2 %v2089_v59 }
  0x37   :  { %477 = vmatpush.msrb.mxu0 %v2111_v62  ;;  %458 = vmatpush.msrb.mxu3 %v1892_v30 }
  0x38   :  { %364 = vmatpush.msrb.mxu1 %v2097_v60  ;;  %388 = vmatpush.msra.mxu2 %v2103_v61 }
  0x39   :  { %389 = vmatmul.f32.vlgmr.msra.gmra.mxu2 %v1944_v39  ;;  %478 = vmatpush.msrb.mxu0 %v2120_v63 }
  0x3a   :  { %365 = vmatpush.msrb.mxu1 %v2111_v62  ;;  %558 = vmatpush.msrb.mxu2 %v1766_v0 }
  0x3b   :  { %459 = vmatpush.msrb.mxu3 %v1909_v33  ;;  %479 = vmatpush.msrb.mxu0 %v2128_v3 }
  0x3c   :  { %366 = vmatpush.msrb.mxu1 %v2120_v63  ;;  %559 = vmatpush.msrb.mxu2 %v1771_v1 }
  0x3d   :  { %460 = vmatpush.msrb.mxu3 %v1928_v36  ;;  %480 = vmatpush.msrb.mxu0 %v2137_v4 }
  0x3e   :  { %367 = vmatpush.msrb.mxu1 %v2128_v3  ;;  %560 = vmatpush.msrb.mxu2 %v1777_v2 }
  0x3f   :  { %578 = vmatpush.msra.mxu3 %v1920_v35  ;;  %598 = vmatpush.msra.mxu0 %v1883_v29 }
  0x40   :  { %368 = vmatpush.msrb.mxu1 %v2137_v4  ;;  %561 = vmatpush.msrb.mxu2 %v1792_v6 }
  0x41   :  { %369 = vmatmul.f32.vlgmr.msrb.gmra.mxu1 %v1944_v39  ;;  %579 = vmatpush.msra.mxu3 %v1940_v38 }
  0x42   :  { %485 = vmatpush.msra.mxu1 %v1883_v29  ;;  %599 = vmatpush.msra.mxu0 %v1898_v31 }
  0x43   :  { %580 = vmatpush.msra.mxu3 %v1970_v42  ;;  %562 = vmatpush.msrb.mxu2 %v1804_v9 }
  0x44   :  { %486 = vmatpush.msra.mxu1 %v1898_v31  ;;  %600 = vmatpush.msra.mxu0 %v1914_v34 }
  0x45   :  { %581 = vmatpush.msra.mxu3 %v1983_v44  ;;  %563 = vmatpush.msrb.mxu2 %v1810_v10 }
  0x46   :  { %487 = vmatpush.msra.mxu1 %v1914_v34  ;;  %601 = vmatpush.msra.mxu0 %v1934_v37 }
  0x47   :  { %582 = vmatpush.msra.mxu3 %v1997_v46  ;;  %564 = vmatpush.msrb.mxu2 %v1828_v15 }
  0x48   :  { %488 = vmatpush.msra.mxu1 %v1934_v37  ;;  %602 = vmatpush.msra.mxu0 %v1950_v40 }
  0x49   :  { %583 = vmatpush.msra.mxu3 %v2011_v48  ;;  %565 = vmatpush.msrb.mxu2 %v1834_v16 }
  0x4a   :  { %489 = vmatpush.msra.mxu1 %v1950_v40  ;;  %603 = vmatpush.msra.mxu0 %v1961_v41 }
  0x4b   :  { %584 = vmatpush.msra.mxu3 %v2026_v50  ;;  %566 = vmatpush.msrb.mxu2 %v1845_v19 }
  0x4c   :  { %490 = vmatpush.msra.mxu1 %v1961_v41  ;;  %604 = vmatpush.msra.mxu0 %v1975_v43 }
  0x4d   :  { %585 = vmatpush.msra.mxu3 %v2040_v52  ;;  %567 = vmatpush.msrb.mxu2 %v1851_v20 }
  0x4e   :  { %491 = vmatpush.msra.mxu1 %v1975_v43  ;;  %605 = vmatpush.msra.mxu0 %v1989_v45 }
  0x4f   :  { %586 = vmatpush.msra.mxu3 %v2054_v54  ;;  %568 = vmatpush.msrb.mxu2 %v1861_v23 }
  0x50   :  { %492 = vmatpush.msra.mxu1 %v1989_v45  ;;  %606 = vmatpush.msra.mxu0 %v2003_v47 }
  0x51   :  { %587 = vmatpush.msra.mxu3 %v2068_v56  ;;  %569 = vmatpush.msrb.mxu2 %v1870_v24 }
  0x52   :  { %493 = vmatpush.msra.mxu1 %v2003_v47  ;;  %607 = vmatpush.msra.mxu0 %v2019_v49 }
  0x53   :  { %588 = vmatpush.msra.mxu3 %v2083_v58  ;;  %570 = vmatpush.msrb.mxu2 %v1876_v26 }
  0x54   :  { %494 = vmatpush.msra.mxu1 %v2019_v49  ;;  %608 = vmatpush.msra.mxu0 %v2032_v51 }
  0x55   :  { %589 = vmatpush.msra.mxu3 %v2097_v60  ;;  %571 = vmatpush.msrb.mxu2 %v1892_v30 }
  0x56   :  { %495 = vmatpush.msra.mxu1 %v2032_v51  ;;  %609 = vmatpush.msra.mxu0 %v2046_v53 }
  0x57   :  { %590 = vmatpush.msra.mxu3 %v2111_v62  ;;  %572 = vmatpush.msrb.mxu2 %v1909_v33 }
  0x58   :  { %496 = vmatpush.msra.mxu1 %v2046_v53  ;;  %610 = vmatpush.msra.mxu0 %v2060_v55 }
  0x59   :  { %591 = vmatpush.msra.mxu3 %v2120_v63  ;;  %573 = vmatpush.msrb.mxu2 %v1928_v36 }
  0x5a   :  { %497 = vmatpush.msra.mxu1 %v2060_v55  ;;  %611 = vmatpush.msra.mxu0 %v2076_v57 }
  0x5b   :  { %592 = vmatpush.msra.mxu3 %v2128_v3  ;;  %691 = vmatpush.msra.mxu2 %v1920_v35 }
  0x5c   :  { %498 = vmatpush.msra.mxu1 %v2076_v57  ;;  %612 = vmatpush.msra.mxu0 %v2089_v59 }
  0x5d   :  { %593 = vmatpush.msra.mxu3 %v2137_v4  ;;  %692 = vmatpush.msra.mxu2 %v1940_v38 }
  0x5e   :  { %499 = vmatpush.msra.mxu1 %v2089_v59  ;;  %613 = vmatpush.msra.mxu0 %v2103_v61 }
  0x5f   :  { %693 = vmatpush.msra.mxu2 %v1970_v42 }
  0x60   :  { %500 = vmatpush.msra.mxu1 %v2103_v61 }
  0x61   :  { %694 = vmatpush.msra.mxu2 %v1983_v44 }
  0x62   :  { %671 = vmatpush.msrb.mxu1 %v1766_v0 }
  0x63   :  { %695 = vmatpush.msra.mxu2 %v1997_v46 }
  0x64   :  { %672 = vmatpush.msrb.mxu1 %v1771_v1 }
  0x65   :  { %696 = vmatpush.msra.mxu2 %v2011_v48 }
  0x66   :  { %673 = vmatpush.msrb.mxu1 %v1777_v2 }
  0x67   :  { %697 = vmatpush.msra.mxu2 %v2026_v50 }
  0x68   :  { %674 = vmatpush.msrb.mxu1 %v1792_v6 }
  0x69   :  { %698 = vmatpush.msra.mxu2 %v2040_v52 }
  0x6a   :  { %675 = vmatpush.msrb.mxu1 %v1804_v9 }
  0x6b   :  { %699 = vmatpush.msra.mxu2 %v2054_v54 }
  0x6c   :  { %676 = vmatpush.msrb.mxu1 %v1810_v10 }
  0x6d   :  { %700 = vmatpush.msra.mxu2 %v2068_v56 }
  0x6e   :  { %677 = vmatpush.msrb.mxu1 %v1828_v15 }
  0x6f   :  { %701 = vmatpush.msra.mxu2 %v2083_v58 }
  0x70   :  { %678 = vmatpush.msrb.mxu1 %v1834_v16 }
  0x71   :  { %702 = vmatpush.msra.mxu2 %v2097_v60 }
  0x72   :  { %679 = vmatpush.msrb.mxu1 %v1845_v19 }
  0x73   :  { %703 = vmatpush.msra.mxu2 %v2111_v62 }
  0x74   :  { %680 = vmatpush.msrb.mxu1 %v1851_v20 }
  0x75   :  { %704 = vmatpush.msra.mxu2 %v2120_v63 }
  0x76   :  { %681 = vmatpush.msrb.mxu1 %v1861_v23 }
  0x77   :  { %705 = vmatpush.msra.mxu2 %v2128_v3 }
  0x78   :  { %682 = vmatpush.msrb.mxu1 %v1870_v24 }
  0x79   :  { %706 = vmatpush.msra.mxu2 %v2137_v4 }
  0x7a   :  { %683 = vmatpush.msrb.mxu1 %v1876_v26 }
  0x7c   :  { %684 = vmatpush.msrb.mxu1 %v1892_v30 }
  0x7e   :  { %685 = vmatpush.msrb.mxu1 %v1909_v33 }
  0x80   :  { %686 = vmatpush.msrb.mxu1 %v1928_v36 }
  0x93   :  { %v209_v39 = vpop.f32.mrf.mxu3 }
  0x94   :  { %v210_v36 = vadd.f32 %v209_v39, %v70_v32 }
  0x96   :  { %v140_v11 = vpop.f32.mrf.mxu0  ;;  %v225_v30 = vrot.slane %v210_v36, 2 }
  0x97   :  { %v141_v14 = vadd.f32 %v140_v11, %v67_v8 }
  0x9a   :  { %v163_v12 = vpop.f32.mrf.mxu2 }
  0x9b   :  { %v164_v13 = vadd.f32 %v163_v12, %v68_v7 }
  0x9c   :  { %v212_v57 = vpop.f32.mrf.mxu3 }
  0x9d   :  { %v223_v17 = vrot.slane %v164_v13, 6  ;;  %v69_v13 = vperm.slane %v65_v5, 2  ;;  %v49_v5 = vld [vmem:[%s2949_s2] sm:$0x3] }
  0x9e   :  { %v143_v27 = vpop.f32.mrf.mxu0  ;;  %50 = vst [vmem:[#allocation6] sm:$0x3] %v49_v5 }
  0x9f   :  { %v235_v21 = vsel %vm234_vm3, %v141_v14, %v223_v17  ;;  %v241_v22 = vsel %vm231_vm2, %v141_v14, %v223_v17  ;;  %v245_v25 = vsel %vm236_vm4, %v223_v17, %v141_v14  ;;  %v144_v12 = vadd.f32 %v143_v27, %v67_v8 }
  0xa0   :  { %v230_v55 = vsel %vm229_vm5, %v141_v14, %v223_v17 }
  0xa2   :  { %v166_v28 = vpop.f32.mrf.mxu2 }
  0xa3   :  { %v167_v11 = vadd.f32 %v166_v28, %v68_v7  ;;  %v47_v7 = vld [vmem:[%s2948_s1] sm:$0x3]  ;;  %v213_v28 = vadd.f32 %v212_v57, %v70_v32  ;;  %s1358_s1 = sshll.u32 %s2959_s12, 4  ;;  %s1359_s1 = int_to_ptr.hbm [resolvable:$true] %s1358_s1 }
  0xa4   :  { %48 = vst [vmem:[#allocation4] sm:$0x3] %v47_v7 }
  0xa5   :  { %v226_v4 = vrot.slane %v167_v11, 6 }
  0xa7   :  { %v249_v61 = vsel %vm229_vm5, %v144_v12, %v226_v4  ;;  %v252_v18 = vsel %vm234_vm3, %v144_v12, %v226_v4  ;;  %v256_v3 = vsel %vm231_vm2, %v144_v12, %v226_v4  ;;  %v260_v33 = vsel %vm236_vm4, %v226_v4, %v144_v12 }
  0xa8   :  { %v228_v12 = vrot.slane %v213_v28, 2 }
  0xaa   :  { %v186_v59 = vpop.f32.mrf.mxu2 }
  0xab   :  { %v187_v63 = vadd.f32 %v186_v59, %v69_v13 }
  0xad   :  { %v224_v62 = vrot.slane %v187_v63, 4 }
  0xaf   :  { %v237_v8 = vsel %vm236_vm4, %v225_v30, %v224_v62  ;;  %v242_v27 = vsel %vm229_vm5, %v224_v62, %v225_v30  ;;  %v246_v4 = vsel %vm234_vm3, %v224_v62, %v225_v30  ;;  %v232_v26 = vsel %vm231_vm2, %v224_v62, %v225_v30 }
  0xb0   :  { %v2264_v36 = vsel %vm238_vm6, %v235_v21, %v237_v8  ;;  %v2267_v59 = vsel %vm114_vm0, %v242_v27, %v241_v22  ;;  %v2270_v63 = vsel %vm238_vm6, %v246_v4, %v245_v25  ;;  %v233_v57 = vsel %vm114_vm0, %v230_v55, %v232_v26  ;;  %v350_v27 = vpop.f32.mrf.mxu1 }
  0xb1   :  { %3002 = vst [vmem:[#allocation27_spill] sm:$0xff] %v2267_v59  ;;  %v400_v26 = vrot.slane %v233_v57, 6  ;;  %v397_v28 = vrot.slane %v233_v57, 4 }
  0xb2   :  { %3003 = vst [vmem:[#allocation28_spill] sm:$0xff] %v2270_v63  ;;  %v189_v39 = vpop.f32.mrf.mxu2 }
  0xb3   :  { %v190_v11 = vadd.f32 %v189_v39, %v69_v13 }
  0xb5   :  { %v227_v60 = vrot.slane %v190_v11, 4 }
  0xb7   :  { %v253_v32 = vsel %vm236_vm4, %v228_v12, %v227_v60  ;;  %v257_v21 = vsel %vm229_vm5, %v227_v60, %v228_v12  ;;  %v261_v22 = vsel %vm234_vm3, %v227_v60, %v228_v12  ;;  %v250_v7 = vsel %vm231_vm2, %v227_v60, %v228_v12 }
  0xb8   :  { %v2280_v25 = vsel %vm114_vm0, %v249_v61, %v250_v7  ;;  %v2283_v13 = vsel %vm238_vm6, %v252_v18, %v253_v32  ;;  %v2286_v30 = vsel %vm114_vm0, %v257_v21, %v256_v3  ;;  %v2289_v62 = vsel %vm238_vm6, %v261_v22, %v260_v33  ;;  %v331_v3 = vld [vmem:[#allocation9] sm:$0x3] }
  0xb9   :  { %3004 = vst [vmem:[#allocation29_spill] sm:$0xff] %v2280_v25 }
  0xba   :  { %3005 = vst [vmem:[#allocation30_spill] sm:$0xff] %v2283_v13 }
  0xbb   :  { %3006 = vst [vmem:[#allocation31_spill] sm:$0xff] %v2286_v30 }
  0xbc   :  { %3007 = vst [vmem:[#allocation32_spill] sm:$0xff] %v2289_v62  ;;  %v390_v55 = vpop.f32.mrf.mxu2 }
  0xbd   :  { %v402_v14 = vadd.f32 %v400_v26, %v390_v55  ;;  %v394_v55 = vrot.slane %v233_v57, 2 }
  0xbe   :  { %v370_v18 = vpop.f32.mrf.mxu1 }
  0xbf   :  { %v403_v17 = vmul.f32 0.5, %v402_v14  ;;  %v399_v11 = vadd.f32 %v397_v28, %v370_v18  ;;  %v329_v14 = vld [vmem:[#allocation6] sm:$0x3]  ;;  %v328_v28 = vld [vmem:[#allocation4] sm:$0x3] }
  0xc1   :  { %1422 = vtanh.f32 %v403_v17 }
  0xc7   :  { %v1423_v5 = vpop.eup %1422 }
  0xc8   :  { %v405_v8 = vadd.f32 1.0, %v1423_v5  ;;  %v396_v5 = vadd.f32 %v394_v55, %v350_v27 }
  0xca   :  { %v406_v60 = vmul.f32 0.5, %v405_v8 }
  0xcc   :  { %v409_v61 = vsub.f32 0.0, %v406_v60  ;;  %v414_v33 = vsub.f32 %v331_v3, %v406_v60 }
  0xce   :  { %v410_v4 = vmul.f32 1.442695, %v409_v61 }
  0xd0   :  { %1424 = vpow2.f32 %v410_v4 }
  0xd6   :  { %v1425_v39 = vpop.eup %1424 }
  0xd7   :  { %v412_v12 = vmul.f32 %v1425_v39, %v331_v3 }
  0xd9   :  { %v2291_v32 = vmax.f32 %v412_v12, %v399_v11 }
  0xdb   :  { %v415_v21 = vsub.f32 %v414_v33, %v2291_v32  ;;  %v418_v22 = vsub.f32 %v399_v11, %v2291_v32 }
  0xdd   :  { %v416_v7 = vmul.f32 1.442695, %v415_v21  ;;  %v419_v26 = vmul.f32 1.442695, %v418_v22 }
  0xdf   :  { %1426 = vpow2.f32 %v416_v7 }
  0xe0   :  { %1428 = vpow2.f32 %v419_v26 }
  0xe1   :  { %1430 = vtanh.f32 %v396_v5 }
  0xe5   :  { %v1427_v17 = vpop.eup %1426 }
  0xe6   :  { %v424_v8 = vmul.f32 %v1427_v17, %v329_v14  ;;  %v1429_v61 = vpop.eup %1428  ;;  %v421_v12 = vmul.f32 %v1427_v17, %v328_v28  ;;  %v3011_v28 = vld [vmem:[#allocation23_spill] sm:$0xff] }
  0xe7   :  { %v1431_v60 = vpop.eup %1430 }
  0xe8   :  { %v2295_v4 = vadd.f32 %v1429_v61, %v424_v8  ;;  %v408_v3 = vmul.f32 %v1431_v60, %v233_v57  ;;  %v3009_v60 = vld [vmem:[#allocation18_spill] sm:$0xff] }
  0xea   :  { %1432 = vrcp.f32 %v2295_v4  ;;  %v437_v33 = vand.u32 2147483648, %v2295_v4  ;;  %v422_v21 = vmul.f32 %v1429_v61, %v408_v3  ;;  %v435_v27 = vand.u32 2147483647, %v2295_v4  ;;  %v3008_v61 = vld [vmem:[#allocation21_spill] sm:$0xff]  ;;  %v3013_v3 = vld [vmem:[#allocation15_spill] sm:$0xff] }
  0xeb   :  { %vm431_vm8 = vweird.f32 %v2295_v4 }
  0xec   :  { %v438_v26 = vor.u32 1.1754944e-38, %v437_v33  ;;  %v2302_v55 = vadd.f32 %v422_v21, %v421_v12  ;;  %vm436_vm10 = vcmp.eq.f32.partialorder %v435_v27, 8.507059e+37  ;;  %v3015_v12 = vld [vmem:[#allocation20_spill] sm:$0xff]  ;;  %v3017_v21 = vld [vmem:[#allocation25_spill] sm:$0xff] }
  0xed   :  { %v3016_v33 = vld [vmem:[#allocation16_spill] sm:$0xff]  ;;  %v3019_v27 = vld [vmem:[#allocation17_spill] sm:$0xff] }
  0xf0   :  { %v1433_v18 = vpop.eup %1432 }
  0xf1   :  { %v427_v39 = vmul.f32 %v1433_v18, %v2295_v4  ;;  %vm432_vm7 = vweird.f32 %v1433_v18 }
  0xf2   :  { %vm433_vm9 = vmor %vm431_vm8, %vm432_vm7 }
  0xf3   :  { %v428_v11 = vsub.f32 1.0, %v427_v39  ;;  %v3012_v39 = vld [vmem:[#allocation19_spill] sm:$0xff] }
  0xf5   :  { %v429_v22 = vmul.f32 %v1433_v18, %v428_v11  ;;  %v3014_v11 = vld [vmem:[#allocation24_spill] sm:$0xff] }
  0xf7   :  { %v430_v7 = vadd.f32 %v1433_v18, %v429_v22  ;;  %v3018_v22 = vld [vmem:[#allocation22_spill] sm:$0xff] }
  0xf9   :  { %v434_v14 = vsel %vm433_vm9, %v1433_v18, %v430_v7  ;;  %v3010_v18 = vld [vmem:[#allocation14_spill] sm:$0xff] }
  0xfa   :  { %v439_v5 = vsel %vm436_vm10, %v438_v26, %v434_v14  ;;  %v3020_v7 = vld [vmem:[#allocation26_spill] sm:$0xff]  ;;  %v240_v26 = vrot.slane %v2264_v36, 2 }
  0xfb   :  { %v440_v57 = vmul.f32 %v439_v5, %v2302_v55 }
  0xfc   :  { %v512_v14 = vrot.slane %v240_v26, 6  ;;  %v509_v59 = vrot.slane %v240_v26, 4 }
  0xfd   :  { %1434 = vtanh.f32 %v440_v57 }
 0x103   :  { %v1435_v17 = vpop.eup %1434 }
 0x104   :  { %442 = vst [vmem:[#allocation3] sm:$0x3] %v1435_v17  ;;  %461 = vmatmul.f32.vlgmr.msrb.gmra.mxu3 %v1435_v17  ;;  %481 = vmatmul.f32.vlgmr.msrb.gmra.mxu0 %v1435_v17 }
 0x105   :  { %501 = vmatmul.f32.vlgmr.msra.gmra.mxu1 %v1435_v17  ;;  %711 = vmatpush.msrb.mxu3 %v1883_v29 }
 0x106   :  { %784 = vmatpush.msrb.mxu0 %v1766_v0  ;;  %804 = vmatpush.msra.mxu1 %v1920_v35 }
 0x107   :  { %712 = vmatpush.msrb.mxu3 %v1898_v31 }
 0x108   :  { %785 = vmatpush.msrb.mxu0 %v1771_v1  ;;  %805 = vmatpush.msra.mxu1 %v1940_v38 }
 0x109   :  { %713 = vmatpush.msrb.mxu3 %v1914_v34 }
 0x10a   :  { %786 = vmatpush.msrb.mxu0 %v1777_v2  ;;  %806 = vmatpush.msra.mxu1 %v1970_v42 }
 0x10b   :  { %714 = vmatpush.msrb.mxu3 %v1934_v37  ;;  %v1238_v8 = vld [vmem:[#allocation3] sm:$0x3] }
 0x10c   :  { %787 = vmatpush.msrb.mxu0 %v1792_v6  ;;  %807 = vmatpush.msra.mxu1 %v1983_v44  ;;  %1274 = vst [vmem:[#allocation1] ss:$4 sm:$0xff] %v1238_v8 }
 0x10d   :  { %715 = vmatpush.msrb.mxu3 %v1950_v40 }
 0x10e   :  { %788 = vmatpush.msrb.mxu0 %v1804_v9  ;;  %808 = vmatpush.msra.mxu1 %v1997_v46 }
 0x10f   :  { %716 = vmatpush.msrb.mxu3 %v1961_v41 }
 0x110   :  { %789 = vmatpush.msrb.mxu0 %v1810_v10  ;;  %809 = vmatpush.msra.mxu1 %v2011_v48 }
 0x111   :  { %717 = vmatpush.msrb.mxu3 %v1975_v43 }
 0x112   :  { %790 = vmatpush.msrb.mxu0 %v1828_v15  ;;  %810 = vmatpush.msra.mxu1 %v2026_v50 }
 0x113   :  { %718 = vmatpush.msrb.mxu3 %v1989_v45 }
 0x114   :  { %791 = vmatpush.msrb.mxu0 %v1834_v16  ;;  %811 = vmatpush.msra.mxu1 %v2040_v52 }
 0x115   :  { %719 = vmatpush.msrb.mxu3 %v2003_v47 }
 0x116   :  { %792 = vmatpush.msrb.mxu0 %v1845_v19  ;;  %812 = vmatpush.msra.mxu1 %v2054_v54 }
 0x117   :  { %720 = vmatpush.msrb.mxu3 %v2019_v49 }
 0x118   :  { %793 = vmatpush.msrb.mxu0 %v1851_v20  ;;  %813 = vmatpush.msra.mxu1 %v2068_v56 }
 0x119   :  { %721 = vmatpush.msrb.mxu3 %v2032_v51 }
 0x11a   :  { %794 = vmatpush.msrb.mxu0 %v1861_v23  ;;  %814 = vmatpush.msra.mxu1 %v2083_v58 }
 0x11b   :  { %722 = vmatpush.msrb.mxu3 %v2046_v53 }
 0x11c   :  { %795 = vmatpush.msrb.mxu0 %v1870_v24  ;;  %815 = vmatpush.msra.mxu1 %v3008_v61 }
 0x11d   :  { %723 = vmatpush.msrb.mxu3 %v3009_v60 }
 0x11e   :  { %796 = vmatpush.msrb.mxu0 %v3010_v18  ;;  %816 = vmatpush.msra.mxu1 %v3011_v28 }
 0x11f   :  { %724 = vmatpush.msrb.mxu3 %v3012_v39 }
 0x120   :  { %797 = vmatpush.msrb.mxu0 %v3013_v3  ;;  %817 = vmatpush.msra.mxu1 %v3014_v11 }
 0x121   :  { %725 = vmatpush.msrb.mxu3 %v3015_v12 }
 0x122   :  { %798 = vmatpush.msrb.mxu0 %v3016_v33  ;;  %818 = vmatpush.msra.mxu1 %v3017_v21 }
 0x123   :  { %726 = vmatpush.msrb.mxu3 %v3018_v22 }
 0x124   :  { %799 = vmatpush.msrb.mxu0 %v3019_v27  ;;  %819 = vmatpush.msra.mxu1 %v3020_v7 }
 0x181   :  { %v482_v63 = vpop.f32.mrf.mxu0 }
 0x182   :  { %v502_v5 = vpop.f32.mrf.mxu1  ;;  %v511_v21 = vadd.f32 %v509_v59, %v482_v63 }
 0x183   :  { %v514_v57 = vadd.f32 %v512_v14, %v502_v5 }
 0x185   :  { %v515_v17 = vmul.f32 0.5, %v514_v57 }
 0x187   :  { %1436 = vtanh.f32 %v515_v17 }
 0x18d   :  { %v1437_v8 = vpop.eup %1436 }
 0x18e   :  { %v517_v62 = vadd.f32 1.0, %v1437_v8 }
 0x190   :  { %v518_v30 = vmul.f32 0.5, %v517_v62 }
 0x192   :  { %v521_v13 = vsub.f32 0.0, %v518_v30  ;;  %v526_v36 = vsub.f32 %v2291_v32, %v518_v30 }
 0x194   :  { %v522_v25 = vmul.f32 1.442695, %v521_v13  ;;  %v462_v13 = vpop.f32.mrf.mxu3 }
 0x196   :  { %1438 = vpow2.f32 %v522_v25  ;;  %v506_v25 = vrot.slane %v240_v26, 2 }
 0x198   :  { %v508_v8 = vadd.f32 %v506_v25, %v462_v13 }
 0x19c   :  { %v1439_v22 = vpop.eup %1438 }
 0x19d   :  { %v524_v27 = vmul.f32 %v1439_v22, %v2291_v32 }
 0x19f   :  { %v2355_v7 = vmax.f32 %v524_v27, %v511_v21 }
 0x1a1   :  { %v527_v14 = vsub.f32 %v526_v36, %v2355_v7  ;;  %v530_v5 = vsub.f32 %v511_v21, %v2355_v7 }
 0x1a3   :  { %v528_v57 = vmul.f32 1.442695, %v527_v14  ;;  %v531_v17 = vmul.f32 1.442695, %v530_v5 }
 0x1a5   :  { %1440 = vpow2.f32 %v528_v57 }
 0x1a6   :  { %1442 = vpow2.f32 %v531_v17 }
 0x1a7   :  { %1444 = vtanh.f32 %v508_v8 }
 0x1ab   :  { %v1441_v62 = vpop.eup %1440 }
 0x1ac   :  { %v536_v59 = vmul.f32 %v1441_v62, %v2295_v4  ;;  %v1443_v63 = vpop.eup %1442  ;;  %v533_v14 = vmul.f32 %v1441_v62, %v2302_v55 }
 0x1ad   :  { %v1445_v30 = vpop.eup %1444 }
 0x1ae   :  { %v2361_v22 = vadd.f32 %v1443_v63, %v536_v59  ;;  %v520_v27 = vmul.f32 %v1445_v30, %v240_v26 }
 0x1b0   :  { %1446 = vrcp.f32 %v2361_v22  ;;  %v549_v5 = vand.u32 2147483648, %v2361_v22  ;;  %v534_v57 = vmul.f32 %v1443_v63, %v520_v27  ;;  %v547_v4 = vand.u32 2147483647, %v2361_v22 }
 0x1b1   :  { %vm543_vm12 = vweird.f32 %v2361_v22 }
 0x1b2   :  { %v550_v25 = vor.u32 1.1754944e-38, %v549_v5  ;;  %v2369_v8 = vadd.f32 %v534_v57, %v533_v14  ;;  %vm548_vm14 = vcmp.eq.f32.partialorder %v547_v4, 8.507059e+37  ;;  %v2442_v4 = vld [vmem:[%s2953_s6 + $0x178] sm:$0xff] }
 0x1b6   :  { %v1447_v32 = vpop.eup %1446 }
 0x1b7   :  { %v539_v21 = vmul.f32 %v1447_v32, %v2361_v22  ;;  %vm544_vm11 = vweird.f32 %v1447_v32 }
 0x1b8   :  { %vm545_vm13 = vmor %vm543_vm12, %vm544_vm11 }
 0x1b9   :  { %v540_v36 = vsub.f32 1.0, %v539_v21 }
 0x1bb   :  { %v541_v17 = vmul.f32 %v1447_v32, %v540_v36 }
 0x1bd   :  { %v542_v13 = vadd.f32 %v1447_v32, %v541_v17 }
 0x1bf   :  { %v546_v59 = vsel %vm545_vm13, %v1447_v32, %v542_v13  ;;  %v2448_v13 = vld [vmem:[%s2953_s6 + $0x168] sm:$0xff] }
 0x1c0   :  { %v551_v26 = vsel %vm548_vm14, %v550_v25, %v546_v59  ;;  %v2454_v25 = vld [vmem:[%s2953_s6 + $0x170] sm:$0xff] }
 0x1c1   :  { %v552_v30 = vmul.f32 %v551_v26, %v2369_v8  ;;  %v2466_v59 = vld [vmem:[%s2953_s6 + $0x150] sm:$0xff]  ;;  %v2472_v26 = vld [vmem:[%s2953_s6 + $0x158] sm:$0xff] }
 0x1c3   :  { %1448 = vtanh.f32 %v552_v30  ;;  %v2478_v30 = vld [vmem:[%s2953_s6 + $0x148] sm:$0xff] }
 0x1c9   :  { %v1449_v55 = vpop.eup %1448 }
 0x1ca   :  { %555 = vst [vmem:[#allocation3 + $0x2] sm:$0x3] %v1449_v55  ;;  %574 = vmatmul.f32.vlgmr.msrb.gmra.mxu2 %v1449_v55  ;;  %594 = vmatmul.f32.vlgmr.msra.gmra.mxu3 %v1449_v55 }
 0x1cb   :  { %614 = vmatmul.f32.vlgmr.msra.gmra.mxu0 %v1449_v55  ;;  %824 = vmatpush.msrb.mxu2 %v1883_v29  ;;  %v2484_v55 = vld [vmem:[%s2953_s6 + $0x138] sm:$0xff] }
 0x1cc   :  { %897 = vmatpush.msra.mxu3 %v1766_v0  ;;  %917 = vmatpush.msra.mxu0 %v1920_v35  ;;  %v3021_v0 = vld [vmem:[#allocation25_spill] sm:$0xff] }
 0x1cd   :  { %825 = vmatpush.msrb.mxu2 %v1898_v31 }
 0x1ce   :  { %898 = vmatpush.msra.mxu3 %v1771_v1  ;;  %918 = vmatpush.msra.mxu0 %v1940_v38  ;;  %v3022_v1 = vld [vmem:[#allocation22_spill] sm:$0xff] }
 0x1cf   :  { %826 = vmatpush.msrb.mxu2 %v1914_v34 }
 0x1d0   :  { %899 = vmatpush.msra.mxu3 %v1777_v2  ;;  %919 = vmatpush.msra.mxu0 %v1970_v42  ;;  %v3023_v2 = vld [vmem:[#allocation17_spill] sm:$0xff] }
 0x1d1   :  { %827 = vmatpush.msrb.mxu2 %v1934_v37  ;;  %v1239_v62 = vld [vmem:[#allocation3 + $0x2] sm:$0x3] }
 0x1d2   :  { %900 = vmatpush.msra.mxu3 %v1792_v6  ;;  %920 = vmatpush.msra.mxu0 %v1983_v44  ;;  %1276 = vst [vmem:[#allocation1 + $0x1] ss:$4 sm:$0xff] %v1239_v62  ;;  %v3024_v6 = vld [vmem:[#allocation26_spill] sm:$0xff] }
 0x1d3   :  { %828 = vmatpush.msrb.mxu2 %v1950_v40  ;;  %v2490_v62 = vld [vmem:[%s2953_s6 + $0x140] sm:$0xff] }
 0x1d4   :  { %901 = vmatpush.msra.mxu3 %v1804_v9  ;;  %921 = vmatpush.msra.mxu0 %v1997_v46  ;;  %v3025_v9 = vld [vmem:[#allocation27_spill] sm:$0xff] }
 0x1d5   :  { %829 = vmatpush.msrb.mxu2 %v1961_v41 }
 0x1d6   :  { %902 = vmatpush.msra.mxu3 %v1810_v10  ;;  %922 = vmatpush.msra.mxu0 %v2011_v48  ;;  %v244_v10 = vrot.slane %v3025_v9, 4  ;;  %v2502_v9 = vld [vmem:[%s2953_s6 + $0x120] sm:$0xff] }
 0x1d7   :  { %830 = vmatpush.msrb.mxu2 %v1975_v43 }
 0x1d8   :  { %903 = vmatpush.msra.mxu3 %v1828_v15  ;;  %923 = vmatpush.msra.mxu0 %v2026_v50  ;;  %v625_v15 = vrot.slane %v244_v10, 6  ;;  %v622_v37 = vrot.slane %v244_v10, 4 }
 0x1d9   :  { %831 = vmatpush.msrb.mxu2 %v1989_v45 }
 0x1da   :  { %904 = vmatpush.msra.mxu3 %v1834_v16  ;;  %924 = vmatpush.msra.mxu0 %v2040_v52 }
 0x1db   :  { %832 = vmatpush.msrb.mxu2 %v2003_v47 }
 0x1dc   :  { %905 = vmatpush.msra.mxu3 %v1845_v19  ;;  %925 = vmatpush.msra.mxu0 %v2054_v54 }
 0x1dd   :  { %833 = vmatpush.msrb.mxu2 %v2019_v49  ;;  %v619_v49 = vrot.slane %v244_v10, 2 }
 0x1de   :  { %906 = vmatpush.msra.mxu3 %v1851_v20  ;;  %926 = vmatpush.msra.mxu0 %v2068_v56 }
 0x1df   :  { %834 = vmatpush.msrb.mxu2 %v2032_v51 }
 0x1e0   :  { %907 = vmatpush.msra.mxu3 %v1861_v23  ;;  %927 = vmatpush.msra.mxu0 %v2083_v58 }
 0x1e1   :  { %835 = vmatpush.msrb.mxu2 %v2046_v53 }
 0x1e2   :  { %908 = vmatpush.msra.mxu3 %v1870_v24  ;;  %928 = vmatpush.msra.mxu0 %v3008_v61 }
 0x1e3   :  { %836 = vmatpush.msrb.mxu2 %v3009_v60 }
 0x1e4   :  { %909 = vmatpush.msra.mxu3 %v3010_v18  ;;  %929 = vmatpush.msra.mxu0 %v3011_v28 }
 0x1e5   :  { %837 = vmatpush.msrb.mxu2 %v3012_v39 }
 0x1e6   :  { %910 = vmatpush.msra.mxu3 %v3013_v3  ;;  %930 = vmatpush.msra.mxu0 %v3014_v11 }
 0x1e7   :  { %838 = vmatpush.msrb.mxu2 %v3015_v12 }
 0x1e8   :  { %911 = vmatpush.msra.mxu3 %v3016_v33  ;;  %931 = vmatpush.msra.mxu0 %v3021_v0 }
 0x1e9   :  { %839 = vmatpush.msrb.mxu2 %v3022_v1  ;;  %v2496_v1 = vld [vmem:[%s2953_s6 + $0x130] sm:$0xff] }
 0x1ea   :  { %912 = vmatpush.msra.mxu3 %v3023_v2  ;;  %932 = vmatpush.msra.mxu0 %v3024_v6 }
 0x248   :  { %v615_v16 = vpop.f32.mrf.mxu0 }
 0x249   :  { %v627_v19 = vadd.f32 %v625_v15, %v615_v16  ;;  %v2514_v15 = vld [vmem:[%s2953_s6 + $0x118] sm:$0xff]  ;;  %v2520_v16 = vld [vmem:[%s2953_s6 + $0x108] sm:$0xff] }
 0x24b   :  { %v628_v20 = vmul.f32 0.5, %v627_v19  ;;  %v2526_v19 = vld [vmem:[%s2953_s6 + $0x110] sm:$0xff] }
 0x24d   :  { %1450 = vtanh.f32 %v628_v20  ;;  %v595_v35 = vpop.f32.mrf.mxu3  ;;  %v575_v48 = vpop.f32.mrf.mxu2  ;;  %v2532_v20 = vld [vmem:[%s2953_s6 + $0x100] sm:$0xff] }
 0x24e   :  { %v624_v40 = vadd.f32 %v622_v37, %v595_v35  ;;  %v621_v51 = vadd.f32 %v619_v49, %v575_v48  ;;  %v2568_v35 = vld [vmem:[%s2953_s6 + $0xd0] sm:$0xff]  ;;  %v2574_v37 = vld [vmem:[%s2953_s6 + $0xc0] sm:$0xff]  ;;  %v2649_v49 = vld [vmem:[%s2953_s6 + $0x48] sm:$0xff] }
 0x24f   :  { %v2636_v48 = vld [vmem:[%s2953_s6 + $0x60] sm:$0xff] }
 0x253   :  { %v1451_v23 = vpop.eup %1450 }
 0x254   :  { %v630_v24 = vadd.f32 1.0, %v1451_v23  ;;  %v2538_v23 = vld [vmem:[%s2953_s6 + $0xf0] sm:$0xff] }
 0x256   :  { %v631_v29 = vmul.f32 0.5, %v630_v24  ;;  %v2544_v24 = vld [vmem:[%s2953_s6 + $0xf8] sm:$0xff] }
 0x258   :  { %v634_v31 = vsub.f32 0.0, %v631_v29  ;;  %v639_v42 = vsub.f32 %v2355_v7, %v631_v29  ;;  %v2550_v29 = vld [vmem:[%s2953_s6 + $0xe8] sm:$0xff] }
 0x25a   :  { %v635_v34 = vmul.f32 1.442695, %v634_v31  ;;  %v2556_v31 = vld [vmem:[%s2953_s6 + $0xd8] sm:$0xff] }
 0x25c   :  { %1452 = vpow2.f32 %v635_v34  ;;  %v2562_v34 = vld [vmem:[%s2953_s6 + $0xe0] sm:$0xff] }
 0x262   :  { %v1453_v38 = vpop.eup %1452 }
 0x263   :  { %v637_v41 = vmul.f32 %v1453_v38, %v2355_v7  ;;  %v2580_v38 = vld [vmem:[%s2953_s6 + $0xc8] sm:$0xff] }
 0x265   :  { %v2423_v43 = vmax.f32 %v637_v41, %v624_v40  ;;  %v2592_v41 = vld [vmem:[%s2953_s6 + $0xa8] sm:$0xff] }
 0x267   :  { %v640_v44 = vsub.f32 %v639_v42, %v2423_v43  ;;  %v643_v45 = vsub.f32 %v624_v40, %v2423_v43  ;;  %v2586_v40 = vld [vmem:[%s2953_s6 + $0xb8] sm:$0xff]  ;;  %v2598_v42 = vld [vmem:[%s2953_s6 + $0xb0] sm:$0xff] }
 0x269   :  { %v641_v46 = vmul.f32 1.442695, %v640_v44  ;;  %v644_v47 = vmul.f32 1.442695, %v643_v45  ;;  %v2604_v44 = vld [vmem:[%s2953_s6 + $0xa0] sm:$0xff]  ;;  %v2610_v45 = vld [vmem:[%s2953_s6 + $0x90] sm:$0xff] }
 0x26b   :  { %1454 = vpow2.f32 %v641_v46  ;;  %v2617_v46 = vld [vmem:[%s2953_s6 + $0x88] sm:$0xff] }
 0x26c   :  { %1456 = vpow2.f32 %v644_v47  ;;  %v2623_v47 = vld [vmem:[%s2953_s6 + $0x78] sm:$0xff] }
 0x26d   :  { %1458 = vtanh.f32 %v621_v51  ;;  %v2675_v51 = vld [vmem:[%s2953_s6 + $0x18] sm:$0xff] }
 0x271   :  { %v1455_v50 = vpop.eup %1454 }
 0x272   :  { %v649_v52 = vmul.f32 %v1455_v50, %v2361_v22  ;;  %v1457_v53 = vpop.eup %1456  ;;  %v646_v33 = vmul.f32 %v1455_v50, %v2369_v8  ;;  %v2460_v8 = vld [vmem:[%s2953_s6 + $0x160] sm:$0xff]  ;;  %v2662_v50 = vld [vmem:[%s2953_s6 + $0x30] sm:$0xff] }
 0x273   :  { %v1459_v60 = vpop.eup %1458 }
 0x274   :  { %v2428_v54 = vadd.f32 %v1457_v53, %v649_v52  ;;  %v633_v3 = vmul.f32 %v1459_v60, %v244_v10  ;;  %v2508_v10 = vld [vmem:[%s2953_s6 + $0x128] sm:$0xff]  ;;  %v2688_v52 = vld [vmem:[%s2953_s6] sm:$0xff] }
 0x276   :  { %1460 = vrcp.f32 %v2428_v54  ;;  %v662_v7 = vand.u32 2147483648, %v2428_v54  ;;  %v647_v63 = vmul.f32 %v1457_v53, %v633_v3  ;;  %v660_v22 = vand.u32 2147483647, %v2428_v54  ;;  %v3026_v53 = vld [vmem:[#allocation28_spill] sm:$0xff] }
 0x277   :  { %vm656_vm0 = vweird.f32 %v2428_v54  ;;  %v248_v60 = vrot.slane %v3026_v53, 6 }
 0x278   :  { %v663_v27 = vor.u32 1.1754944e-38, %v662_v7  ;;  %v2436_v36 = vadd.f32 %v647_v63, %v646_v33  ;;  %vm661_vm2 = vcmp.eq.f32.partialorder %v660_v22, 8.507059e+37 }
 0x27c   :  { %v1461_v18 = vpop.eup %1460 }
 0x27d   :  { %v652_v39 = vmul.f32 %v1461_v18, %v2428_v54  ;;  %vm657_vm15 = vweird.f32 %v1461_v18 }
 0x27e   :  { %vm658_vm1 = vmor %vm656_vm0, %vm657_vm15 }
 0x27f   :  { %v653_v12 = vsub.f32 1.0, %v652_v39 }
 0x281   :  { %v654_v32 = vmul.f32 %v1461_v18, %v653_v12 }
 0x283   :  { %v655_v21 = vadd.f32 %v1461_v18, %v654_v32 }
 0x285   :  { %v659_v14 = vsel %vm658_vm1, %v1461_v18, %v655_v21  ;;  %v738_v18 = vrot.slane %v248_v60, 6  ;;  %v735_v21 = vrot.slane %v248_v60, 4 }
 0x286   :  { %v664_v5 = vsel %vm661_vm2, %v663_v27, %v659_v14 }
 0x287   :  { %v665_v57 = vmul.f32 %v664_v5, %v2436_v36 }
 0x289   :  { %1462 = vtanh.f32 %v665_v57 }
 0x28f   :  { %v1463_v17 = vpop.eup %1462 }
 0x290   :  { %668 = vst [vmem:[#allocation3 + $0x4] sm:$0x3] %v1463_v17  ;;  %687 = vmatmul.f32.vlgmr.msrb.gmra.mxu1 %v1463_v17  ;;  %707 = vmatmul.f32.vlgmr.msra.gmra.mxu2 %v1463_v17 }
 0x291   :  { %727 = vmatmul.f32.vlgmr.msrb.gmra.mxu3 %v1463_v17  ;;  %937 = vmatpush.msrb.mxu1 %v2442_v4 }
 0x292   :  { %1010 = vmatpush.msra.mxu2 %v2448_v13  ;;  %1030 = vmatpush.msrb.mxu3 %v2454_v25 }
 0x293   :  { %938 = vmatpush.msrb.mxu1 %v2460_v8 }
 0x294   :  { %1011 = vmatpush.msra.mxu2 %v2466_v59  ;;  %1031 = vmatpush.msrb.mxu3 %v2472_v26 }
 0x295   :  { %939 = vmatpush.msrb.mxu1 %v2478_v30 }
 0x296   :  { %1012 = vmatpush.msra.mxu2 %v2484_v55  ;;  %1032 = vmatpush.msrb.mxu3 %v2490_v62 }
 0x297   :  { %940 = vmatpush.msrb.mxu1 %v2496_v1  ;;  %v1240_v2 = vld [vmem:[#allocation3 + $0x4] sm:$0x3] }
 0x298   :  { %1013 = vmatpush.msra.mxu2 %v2502_v9  ;;  %1033 = vmatpush.msrb.mxu3 %v2508_v10  ;;  %1278 = vst [vmem:[#allocation1 + $0x2] ss:$4 sm:$0xff] %v1240_v2 }
 0x299   :  { %941 = vmatpush.msrb.mxu1 %v2514_v15 }
 0x29a   :  { %1014 = vmatpush.msra.mxu2 %v2520_v16  ;;  %1034 = vmatpush.msrb.mxu3 %v2526_v19 }
 0x29b   :  { %942 = vmatpush.msrb.mxu1 %v2532_v20 }
 0x29c   :  { %1015 = vmatpush.msra.mxu2 %v2538_v23  ;;  %1035 = vmatpush.msrb.mxu3 %v2544_v24 }
 0x29d   :  { %943 = vmatpush.msrb.mxu1 %v2550_v29 }
 0x29e   :  { %1016 = vmatpush.msra.mxu2 %v2556_v31  ;;  %1036 = vmatpush.msrb.mxu3 %v2562_v34 }
 0x29f   :  { %944 = vmatpush.msrb.mxu1 %v2568_v35 }
 0x2a0   :  { %1017 = vmatpush.msra.mxu2 %v2574_v37  ;;  %1037 = vmatpush.msrb.mxu3 %v2580_v38 }
 0x2a1   :  { %945 = vmatpush.msrb.mxu1 %v2586_v40 }
 0x2a2   :  { %1018 = vmatpush.msra.mxu2 %v2592_v41  ;;  %1038 = vmatpush.msrb.mxu3 %v2598_v42 }
 0x2a3   :  { %946 = vmatpush.msrb.mxu1 %v2604_v44 }
 0x2a4   :  { %1019 = vmatpush.msra.mxu2 %v2610_v45  ;;  %1039 = vmatpush.msrb.mxu3 %v2068_v56  ;;  %v2630_v56 = vld [vmem:[%s2953_s6 + $0x70] sm:$0xff] }
 0x2a5   :  { %947 = vmatpush.msrb.mxu1 %v2617_v46 }
 0x2a6   :  { %1020 = vmatpush.msra.mxu2 %v2623_v47  ;;  %1040 = vmatpush.msrb.mxu3 %v2083_v58  ;;  %v2643_v58 = vld [vmem:[%s2953_s6 + $0x58] sm:$0xff] }
 0x2a7   :  { %948 = vmatpush.msrb.mxu1 %v2630_v56 }
 0x2a8   :  { %1021 = vmatpush.msra.mxu2 %v2636_v48  ;;  %1041 = vmatpush.msrb.mxu3 %v3008_v61  ;;  %v2656_v61 = vld [vmem:[%s2953_s6 + $0x40] sm:$0xff] }
 0x2a9   :  { %949 = vmatpush.msrb.mxu1 %v2643_v58 }
 0x2aa   :  { %1022 = vmatpush.msra.mxu2 %v2649_v49  ;;  %1042 = vmatpush.msrb.mxu3 %v3011_v28  ;;  %v2669_v28 = vld [vmem:[%s2953_s6 + $0x28] sm:$0xff] }
 0x2ab   :  { %950 = vmatpush.msrb.mxu1 %v2656_v61 }
 0x2ac   :  { %1023 = vmatpush.msra.mxu2 %v2662_v50  ;;  %1043 = vmatpush.msrb.mxu3 %v3014_v11  ;;  %v2682_v11 = vld [vmem:[%s2953_s6 + $0x10] sm:$0xff] }
 0x2ad   :  { %951 = vmatpush.msrb.mxu1 %v2669_v28 }
 0x2ae   :  { %1024 = vmatpush.msra.mxu2 %v2675_v51  ;;  %1044 = vmatpush.msrb.mxu3 %v3021_v0 }
 0x2af   :  { %952 = vmatpush.msrb.mxu1 %v2682_v11 }
 0x2b0   :  { %1025 = vmatpush.msra.mxu2 %v2688_v52  ;;  %1045 = vmatpush.msrb.mxu3 %v3024_v6 }
 0x313   :  { %v708_v22 = vpop.f32.mrf.mxu2 }
 0x314   :  { %v728_v0 = vpop.f32.mrf.mxu3  ;;  %v737_v14 = vadd.f32 %v735_v21, %v708_v22 }
 0x315   :  { %v740_v39 = vadd.f32 %v738_v18, %v728_v0  ;;  %v688_v0 = vpop.f32.mrf.mxu1 }
 0x317   :  { %v741_v3 = vmul.f32 0.5, %v740_v39  ;;  %v732_v39 = vrot.slane %v248_v60, 2 }
 0x319   :  { %1464 = vtanh.f32 %v741_v3 }
 0x31f   :  { %v1465_v12 = vpop.eup %1464 }
 0x320   :  { %v743_v33 = vadd.f32 1.0, %v1465_v12  ;;  %v734_v12 = vadd.f32 %v732_v39, %v688_v0 }
 0x322   :  { %v744_v7 = vmul.f32 0.5, %v743_v33 }
 0x324   :  { %v747_v63 = vsub.f32 0.0, %v744_v7  ;;  %v752_v57 = vsub.f32 %v2423_v43, %v744_v7 }
 0x326   :  { %v748_v32 = vmul.f32 1.442695, %v747_v63 }
 0x328   :  { %1466 = vpow2.f32 %v748_v32 }
 0x32e   :  { %v1467_v27 = vpop.eup %1466 }
 0x32f   :  { %v750_v5 = vmul.f32 %v1467_v27, %v2423_v43 }
 0x331   :  { %v2694_v6 = vmax.f32 %v750_v5, %v737_v14 }
 0x333   :  { %v753_v17 = vsub.f32 %v752_v57, %v2694_v6  ;;  %v756_v2 = vsub.f32 %v737_v14, %v2694_v6 }
 0x335   :  { %v754_v53 = vmul.f32 1.442695, %v753_v17  ;;  %v757_v18 = vmul.f32 1.442695, %v756_v2 }
 0x337   :  { %1468 = vpow2.f32 %v754_v53 }
 0x338   :  { %1470 = vpow2.f32 %v757_v18 }
 0x339   :  { %1472 = vtanh.f32 %v734_v12 }
 0x33d   :  { %v1469_v3 = vpop.eup %1468 }
 0x33e   :  { %v762_v33 = vmul.f32 %v1469_v3, %v2428_v54  ;;  %v1471_v63 = vpop.eup %1470  ;;  %v759_v14 = vmul.f32 %v1469_v3, %v2436_v36 }
 0x33f   :  { %v1473_v43 = vpop.eup %1472 }
 0x340   :  { %v2700_v32 = vadd.f32 %v1471_v63, %v762_v33  ;;  %v746_v21 = vmul.f32 %v1473_v43, %v248_v60 }
 0x342   :  { %1474 = vrcp.f32 %v2700_v32  ;;  %v775_v5 = vand.u32 2147483648, %v2700_v32  ;;  %v760_v57 = vmul.f32 %v1471_v63, %v746_v21  ;;  %v773_v54 = vand.u32 2147483647, %v2700_v32 }
 0x343   :  { %vm769_vm4 = vweird.f32 %v2700_v32 }
 0x344   :  { %v776_v53 = vor.u32 1.1754944e-38, %v775_v5  ;;  %v2708_v18 = vadd.f32 %v760_v57, %v759_v14  ;;  %vm774_vm6 = vcmp.eq.f32.partialorder %v773_v54, 8.507059e+37 }
 0x348   :  { %v1475_v7 = vpop.eup %1474 }
 0x349   :  { %v765_v22 = vmul.f32 %v1475_v7, %v2700_v32  ;;  %vm770_vm3 = vweird.f32 %v1475_v7 }
 0x34a   :  { %vm771_vm5 = vmor %vm769_vm4, %vm770_vm3 }
 0x34b   :  { %v766_v27 = vsub.f32 1.0, %v765_v22 }
 0x34d   :  { %v767_v17 = vmul.f32 %v1475_v7, %v766_v27 }
 0x34f   :  { %v768_v2 = vadd.f32 %v1475_v7, %v767_v17 }
 0x351   :  { %v772_v0 = vsel %vm771_vm5, %v1475_v7, %v768_v2 }
 0x352   :  { %v777_v60 = vsel %vm774_vm6, %v776_v53, %v772_v0 }
 0x353   :  { %v778_v39 = vmul.f32 %v777_v60, %v2708_v18 }
 0x355   :  { %1476 = vtanh.f32 %v778_v39 }
 0x35b   :  { %v1477_v36 = vpop.eup %1476 }
 0x35c   :  { %781 = vst [vmem:[#allocation3 + $0x6] sm:$0x3] %v1477_v36  ;;  %800 = vmatmul.f32.vlgmr.msrb.gmra.mxu0 %v1477_v36  ;;  %820 = vmatmul.f32.vlgmr.msra.gmra.mxu1 %v1477_v36 }
 0x35d   :  { %840 = vmatmul.f32.vlgmr.msrb.gmra.mxu2 %v1477_v36  ;;  %1050 = vmatpush.msrb.mxu0 %v2442_v4 }
 0x35e   :  { %1123 = vmatpush.msra.mxu1 %v2448_v13  ;;  %1143 = vmatpush.msrb.mxu2 %v2454_v25  ;;  %v1575_v13 = vld [vmem:[%s2953_s6 + $0x98] sm:$0xff]  ;;  %v1576_v25 = vld [vmem:[%s2953_s6 + $0x80] sm:$0xff] }
 0x35f   :  { %1051 = vmatpush.msrb.mxu0 %v2460_v8 }
 0x360   :  { %1124 = vmatpush.msra.mxu1 %v2466_v59  ;;  %1144 = vmatpush.msrb.mxu2 %v2472_v26  ;;  %v1577_v59 = vld [vmem:[%s2953_s6 + $0x68] sm:$0xff]  ;;  %v1578_v26 = vld [vmem:[%s2953_s6 + $0x50] sm:$0xff] }
 0x361   :  { %1052 = vmatpush.msrb.mxu0 %v2478_v30 }
 0x362   :  { %1125 = vmatpush.msra.mxu1 %v2484_v55  ;;  %1145 = vmatpush.msrb.mxu2 %v2490_v62  ;;  %v1579_v55 = vld [vmem:[%s2953_s6 + $0x38] sm:$0xff]  ;;  %v1580_v62 = vld [vmem:[%s2953_s6 + $0x20] sm:$0xff] }
 0x363   :  { %1053 = vmatpush.msrb.mxu0 %v2496_v1  ;;  %v1241_v3 = vld [vmem:[#allocation3 + $0x6] sm:$0x3] }
 0x364   :  { %1280 = vst [vmem:[#allocation1 + $0x3] ss:$4 sm:$0xff] %v1241_v3  ;;  %1126 = vmatpush.msra.mxu1 %v2502_v9  ;;  %1146 = vmatpush.msrb.mxu2 %v2508_v10  ;;  %v1581_v9 = vld [vmem:[%s2953_s6 + $0x8] sm:$0xff]  ;;  %v3027_v10 = vld [vmem:[#allocation29_spill] sm:$0xff]  ;;  %s1685_s6 = smov [#allocation4]  }
 0x365   :  { %1054 = vmatpush.msrb.mxu0 %v2514_v15  ;;  %v845_v7 = vrot.slane %v3027_v10, 2  ;;  %s1345_s28 = sshll.u32 %s1685_s6, 4  ;;  %s1346_s28 = int_to_ptr.vmem [resolvable:$true] %s1345_s28 }
 0x366   :  { %1127 = vmatpush.msra.mxu1 %v2520_v16  ;;  %1147 = vmatpush.msrb.mxu2 %v2526_v19  ;;  %v851_v16 = vrot.slane %v3027_v10, 6 }
 0x367   :  { %1055 = vmatpush.msrb.mxu0 %v2532_v20 }
 0x368   :  { %1128 = vmatpush.msra.mxu1 %v2538_v23  ;;  %1148 = vmatpush.msrb.mxu2 %v2544_v24 }
 0x369   :  { %1056 = vmatpush.msrb.mxu0 %v2550_v29 }
 0x36a   :  { %1129 = vmatpush.msra.mxu1 %v2556_v31  ;;  %1149 = vmatpush.msrb.mxu2 %v2562_v34 }
 0x36b   :  { %1057 = vmatpush.msrb.mxu0 %v2568_v35 }
 0x36c   :  { %1130 = vmatpush.msra.mxu1 %v2574_v37  ;;  %1150 = vmatpush.msrb.mxu2 %v2580_v38 }
 0x36d   :  { %1058 = vmatpush.msrb.mxu0 %v2586_v40 }
 0x36e   :  { %1131 = vmatpush.msra.mxu1 %v2592_v41  ;;  %1151 = vmatpush.msrb.mxu2 %v2598_v42 }
 0x36f   :  { %1059 = vmatpush.msrb.mxu0 %v2604_v44 }
 0x370   :  { %1132 = vmatpush.msra.mxu1 %v2610_v45  ;;  %1152 = vmatpush.msrb.mxu2 %v1575_v13  ;;  %v848_v45 = vrot.slane %v3027_v10, 4 }
 0x371   :  { %1060 = vmatpush.msrb.mxu0 %v2617_v46 }
 0x372   :  { %1133 = vmatpush.msra.mxu1 %v2623_v47  ;;  %1153 = vmatpush.msrb.mxu2 %v1576_v25 }
 0x373   :  { %1061 = vmatpush.msrb.mxu0 %v2630_v56 }
 0x374   :  { %1134 = vmatpush.msra.mxu1 %v2636_v48  ;;  %1154 = vmatpush.msrb.mxu2 %v1577_v59 }
 0x375   :  { %1062 = vmatpush.msrb.mxu0 %v2643_v58 }
 0x376   :  { %1135 = vmatpush.msra.mxu1 %v2649_v49  ;;  %1155 = vmatpush.msrb.mxu2 %v1578_v26 }
 0x377   :  { %1063 = vmatpush.msrb.mxu0 %v2656_v61 }
 0x378   :  { %1136 = vmatpush.msra.mxu1 %v2662_v50  ;;  %1156 = vmatpush.msrb.mxu2 %v1579_v55 }
 0x379   :  { %1064 = vmatpush.msrb.mxu0 %v2669_v28 }
 0x37a   :  { %1137 = vmatpush.msra.mxu1 %v2675_v51  ;;  %1157 = vmatpush.msrb.mxu2 %v1580_v62 }
 0x37b   :  { %1065 = vmatpush.msrb.mxu0 %v2682_v11 }
 0x37c   :  { %1138 = vmatpush.msra.mxu1 %v2688_v52  ;;  %1158 = vmatpush.msrb.mxu2 %v1581_v9  ;;  %v1257_v9 = vld [vmem:[%s2955_s8 + $0x58] sm:$0xff] }
 0x3d9   :  { %v821_v42 = vpop.f32.mrf.mxu1  ;;  %v801_v43 = vpop.f32.mrf.mxu0 }
 0x3da   :  { %v850_v48 = vadd.f32 %v848_v45, %v821_v42  ;;  %v847_v21 = vadd.f32 %v845_v7, %v801_v43  ;;  %v1248_v43 = vld [vmem:[%s2955_s8 + $0x10] sm:$0xff] }
 0x3e0   :  { %v841_v19 = vpop.f32.mrf.mxu2 }
 0x3e1   :  { %v853_v23 = vadd.f32 %v851_v16, %v841_v19 }
 0x3e3   :  { %v854_v24 = vmul.f32 0.5, %v853_v23  ;;  %v1256_v23 = vld [vmem:[%s2955_s8 + $0x50] sm:$0xff] }
 0x3e5   :  { %1478 = vtanh.f32 %v854_v24 }
 0x3eb   :  { %v1479_v31 = vpop.eup %1478 }
 0x3ec   :  { %v856_v34 = vadd.f32 1.0, %v1479_v31 }
 0x3ee   :  { %v857_v37 = vmul.f32 0.5, %v856_v34  ;;  %v1255_v34 = vld [vmem:[%s2955_s8 + $0x48] sm:$0xff] }
 0x3f0   :  { %v860_v38 = vsub.f32 0.0, %v857_v37  ;;  %v865_v51 = vsub.f32 %v2694_v6, %v857_v37 }
 0x3f2   :  { %v861_v41 = vmul.f32 1.442695, %v860_v38 }
 0x3f4   :  { %1480 = vpow2.f32 %v861_v41  ;;  %v1254_v41 = vld [vmem:[%s2955_s8 + $0x40] sm:$0xff] }
 0x3fa   :  { %v1481_v47 = vpop.eup %1480 }
 0x3fb   :  { %v863_v49 = vmul.f32 %v1481_v47, %v2694_v6  ;;  %v1253_v47 = vld [vmem:[%s2955_s8 + $0x38] sm:$0xff] }
 0x3fd   :  { %v2776_v50 = vmax.f32 %v863_v49, %v850_v48  ;;  %v1251_v49 = vld [vmem:[%s2955_s8 + $0x28] sm:$0xff] }
 0x3ff   :  { %v866_v52 = vsub.f32 %v865_v51, %v2776_v50  ;;  %v869_v12 = vsub.f32 %v850_v48, %v2776_v50  ;;  %v1252_v48 = vld [vmem:[%s2955_s8 + $0x30] sm:$0xff] }
 0x401   :  { %v867_v33 = vmul.f32 1.442695, %v866_v52  ;;  %v870_v63 = vmul.f32 1.442695, %v869_v12  ;;  %v1250_v52 = vld [vmem:[%s2955_s8 + $0x20] sm:$0xff] }
 0x403   :  { %1482 = vpow2.f32 %v867_v33 }
 0x404   :  { %1484 = vpow2.f32 %v870_v63  ;;  %v1249_v63 = vld [vmem:[%s2955_s8 + $0x18] sm:$0xff] }
 0x405   :  { %1486 = vtanh.f32 %v847_v21  ;;  %v1247_v21 = vld [vmem:[%s2955_s8 + $0x8] sm:$0xff] }
 0x409   :  { %v1483_v22 = vpop.eup %1482 }
 0x40a   :  { %v875_v27 = vmul.f32 %v1483_v22, %v2700_v32  ;;  %v1485_v14 = vpop.eup %1484  ;;  %v872_v53 = vmul.f32 %v1483_v22, %v2708_v18 }
 0x40b   :  { %v1487_v6 = vpop.eup %1486 }
 0x40c   :  { %v2783_v5 = vadd.f32 %v1485_v14, %v875_v27  ;;  %v859_v54 = vmul.f32 %v1487_v6, %v3027_v10 }
 0x40e   :  { %1488 = vrcp.f32 %v2783_v5  ;;  %v888_v0 = vand.u32 2147483648, %v2783_v5  ;;  %v873_v60 = vmul.f32 %v1485_v14, %v859_v54  ;;  %v886_v32 = vand.u32 2147483647, %v2783_v5  ;;  %v1246_v14 = vld [vmem:[%s2955_s8] sm:$0xff] }
 0x40f   :  { %vm882_vm8 = vweird.f32 %v2783_v5 }
 0x410   :  { %v889_v3 = vor.u32 1.1754944e-38, %v888_v0  ;;  %v2792_v13 = vadd.f32 %v873_v60, %v872_v53  ;;  %vm887_vm10 = vcmp.eq.f32.partialorder %v886_v32, 8.507059e+37 }
 0x414   :  { %v1489_v57 = vpop.eup %1488 }
 0x415   :  { %v878_v17 = vmul.f32 %v1489_v57, %v2783_v5  ;;  %vm883_vm7 = vweird.f32 %v1489_v57 }
 0x416   :  { %vm884_vm9 = vmor %vm882_vm8, %vm883_vm7 }
 0x417   :  { %v879_v2 = vsub.f32 1.0, %v878_v17 }
 0x419   :  { %v880_v39 = vmul.f32 %v1489_v57, %v879_v2 }
 0x41b   :  { %v881_v36 = vadd.f32 %v1489_v57, %v880_v39 }
 0x41d   :  { %v885_v25 = vsel %vm884_vm9, %v1489_v57, %v881_v36 }
 0x41e   :  { %v890_v59 = vsel %vm887_vm10, %v889_v3, %v885_v25 }
 0x41f   :  { %v891_v26 = vmul.f32 %v890_v59, %v2792_v13 }
 0x421   :  { %1490 = vtanh.f32 %v891_v26 }
 0x427   :  { %v1491_v18 = vpop.eup %1490 }
 0x428   :  { %894 = vst [vmem:[#allocation3 + $0x8] sm:$0x3] %v1491_v18  ;;  %913 = vmatmul.f32.vlgmr.msra.gmra.mxu3 %v1491_v18  ;;  %933 = vmatmul.f32.vlgmr.msra.gmra.mxu0 %v1491_v18 }
 0x429   :  { %953 = vmatmul.f32.vlgmr.msrb.gmra.mxu1 %v1491_v18  ;;  %1163 = vmatpush.msra.mxu3 %v2442_v4  ;;  %v3028_v4 = vld [vmem:[#allocation30_spill] sm:$0xff] }
 0x42b   :  { %1164 = vmatpush.msra.mxu3 %v2460_v8  ;;  %v2812_v8 = vrot.slane %v3028_v4, 2  ;;  %v3029_v4 = vld [vmem:[#allocation31_spill] sm:$0xff] }
 0x42d   :  { %1165 = vmatpush.msra.mxu3 %v2478_v30  ;;  %v964_v30 = vrot.slane %v2812_v8, 6  ;;  %v961_v62 = vrot.slane %v2812_v8, 4  ;;  %v958_v51 = vrot.slane %v2812_v8, 2 }
 0x42f   :  { %1166 = vmatpush.msra.mxu3 %v2496_v1  ;;  %v1242_v55 = vld [vmem:[#allocation3 + $0x8] sm:$0x3] }
 0x430   :  { %1282 = vst [vmem:[#allocation1 + $0x20] ss:$4 sm:$0xff] %v1242_v55  ;;  %v1289_v55 = vld.sshfl [vmem:[#allocation1] sm:$0xff pattern:$0x73625140] }
 0x431   :  { %1167 = vmatpush.msra.mxu3 %v2514_v15 }
 0x433   :  { %1168 = vmatpush.msra.mxu3 %v2532_v20 }
 0x435   :  { %1169 = vmatpush.msra.mxu3 %v2550_v29 }
 0x437   :  { %1170 = vmatpush.msra.mxu3 %v2568_v35 }
 0x439   :  { %1171 = vmatpush.msra.mxu3 %v2586_v40 }
 0x43b   :  { %1172 = vmatpush.msra.mxu3 %v2604_v44 }
 0x43d   :  { %1173 = vmatpush.msra.mxu3 %v2617_v46  ;;  %v1261_v46 = vld [vmem:[%s2955_s8 + $0x78] sm:$0xff] }
 0x43e   :  { %1293 = vmatpush.msra.mxu0 %v1261_v46 }
 0x43f   :  { %1174 = vmatpush.msra.mxu3 %v2630_v56 }
 0x441   :  { %1175 = vmatpush.msra.mxu3 %v2643_v58  ;;  %v1260_v58 = vld [vmem:[%s2955_s8 + $0x70] sm:$0xff] }
 0x442   :  { %1294 = vmatpush.msra.mxu0 %v1260_v58 }
 0x443   :  { %1176 = vmatpush.msra.mxu3 %v2656_v61  ;;  %v1259_v61 = vld [vmem:[%s2955_s8 + $0x68] sm:$0xff] }
 0x444   :  { %1295 = vmatpush.msra.mxu0 %v1259_v61 }
 0x445   :  { %1177 = vmatpush.msra.mxu3 %v2669_v28  ;;  %v1258_v28 = vld [vmem:[%s2955_s8 + $0x60] sm:$0xff]  ;;  %s1380_s8 = sshll.u32 %s2961_s14, 4  ;;  %s1381_s8 = int_to_ptr.hbm [resolvable:$true] %s1380_s8 }
 0x446   :  { %1296 = vmatpush.msra.mxu0 %v1258_v28 }
 0x447   :  { %1178 = vmatpush.msra.mxu3 %v2682_v11 }
 0x448   :  { %1297 = vmatpush.msra.mxu0 %v1257_v9 }
 0x44a   :  { %1298 = vmatpush.msra.mxu0 %v1256_v23 }
 0x44c   :  { %1299 = vmatpush.msra.mxu0 %v1255_v34 }
 0x44e   :  { %1300 = vmatpush.msra.mxu0 %v1254_v41 }
 0x450   :  { %1301 = vmatpush.msra.mxu0 %v1253_v47 }
 0x452   :  { %1302 = vmatpush.msra.mxu0 %v1252_v48 }
 0x454   :  { %1303 = vmatpush.msra.mxu0 %v1251_v49 }
 0x456   :  { %1304 = vmatpush.msra.mxu0 %v1250_v52 }
 0x458   :  { %1305 = vmatpush.msra.mxu0 %v1249_v63 }
 0x45a   :  { %1306 = vmatpush.msra.mxu0 %v1248_v43 }
 0x45c   :  { %1307 = vmatpush.msra.mxu0 %v1247_v21 }
 0x45e   :  { %1308 = vmatpush.msra.mxu0 %v1246_v14 }
 0x4a5   :  { %v934_v11 = vpop.f32.mrf.mxu0 }
 0x4a6   :  { %v954_v1 = vpop.f32.mrf.mxu1  ;;  %v963_v16 = vadd.f32 %v961_v62, %v934_v11 }
 0x4a7   :  { %v966_v15 = vadd.f32 %v964_v30, %v954_v1 }
 0x4a9   :  { %v967_v20 = vmul.f32 0.5, %v966_v15 }
 0x4ab   :  { %1492 = vtanh.f32 %v967_v20 }
 0x4b1   :  { %v1493_v29 = vpop.eup %1492 }
 0x4b2   :  { %v969_v35 = vadd.f32 1.0, %v1493_v29  ;;  %v2888_v29 = vld [vmem:[%s2956_s9] ss:$0 sm:$0xff] }
 0x4b4   :  { %v970_v40 = vmul.f32 0.5, %v969_v35 }
 0x4b6   :  { %v973_v44 = vsub.f32 0.0, %v970_v40  ;;  %v978_v31 = vsub.f32 %v2776_v50, %v970_v40 }
 0x4b8   :  { %v974_v56 = vmul.f32 1.442695, %v973_v44 }
 0x4ba   :  { %1494 = vpow2.f32 %v974_v56 }
 0x4c0   :  { %v1495_v10 = vpop.eup %1494 }
 0x4c1   :  { %v976_v19 = vmul.f32 %v1495_v10, %v2776_v50  ;;  %v914_v50 = vpop.f32.mrf.mxu3 }
 0x4c2   :  { %v960_v33 = vadd.f32 %v958_v51, %v914_v50 }
 0x4c3   :  { %v2835_v24 = vmax.f32 %v976_v19, %v963_v16 }
 0x4c5   :  { %v979_v37 = vsub.f32 %v978_v31, %v2835_v24  ;;  %v982_v38 = vsub.f32 %v963_v16, %v2835_v24 }
 0x4c7   :  { %v980_v42 = vmul.f32 1.442695, %v979_v37  ;;  %v983_v45 = vmul.f32 1.442695, %v982_v38 }
 0x4c9   :  { %1496 = vpow2.f32 %v980_v42 }
 0x4ca   :  { %1498 = vpow2.f32 %v983_v45 }
 0x4cb   :  { %1500 = vtanh.f32 %v960_v33 }
 0x4cf   :  { %v1497_v12 = vpop.eup %1496 }
 0x4d0   :  { %v988_v7 = vmul.f32 %v1497_v12, %v2783_v5  ;;  %v1499_v22 = vpop.eup %1498  ;;  %v985_v2 = vmul.f32 %v1497_v12, %v2792_v13 }
 0x4d1   :  { %v1501_v6 = vpop.eup %1500 }
 0x4d2   :  { %v2869_v27 = vadd.f32 %v1499_v22, %v988_v7  ;;  %v972_v17 = vmul.f32 %v1501_v6, %v2812_v8  ;;  %v259_v8 = vrot.slane %v3029_v4, 4 }
 0x4d4   :  { %1502 = vrcp.f32 %v2869_v27  ;;  %v1001_v53 = vand.u32 2147483648, %v2869_v27  ;;  %v986_v0 = vmul.f32 %v1499_v22, %v972_v17  ;;  %v999_v39 = vand.u32 2147483647, %v2869_v27 }
 0x4d5   :  { %vm995_vm12 = vweird.f32 %v2869_v27  ;;  %v1077_v30 = vrot.slane %v259_v8, 6  ;;  %v1074_v10 = vrot.slane %v259_v8, 4  ;;  %v1071_v47 = vrot.slane %v259_v8, 2 }
 0x4d6   :  { %v1002_v36 = vor.u32 1.1754944e-38, %v1001_v53  ;;  %v2881_v3 = vadd.f32 %v986_v0, %v985_v2  ;;  %vm1000_vm14 = vcmp.eq.f32.partialorder %v999_v39, 8.507059e+37 }
 0x4da   :  { %v1503_v5 = vpop.eup %1502 }
 0x4db   :  { %v991_v57 = vmul.f32 %v1503_v5, %v2869_v27  ;;  %vm996_vm11 = vweird.f32 %v1503_v5 }
 0x4dc   :  { %vm997_vm13 = vmor %vm995_vm12, %vm996_vm11 }
 0x4dd   :  { %v992_v54 = vsub.f32 1.0, %v991_v57 }
 0x4df   :  { %v993_v60 = vmul.f32 %v1503_v5, %v992_v54 }
 0x4e1   :  { %v994_v32 = vadd.f32 %v1503_v5, %v993_v60  ;;  %v3030_v60 = vld [vmem:[#allocation32_spill] sm:$0xff] }
 0x4e2   :  { %v263_v39 = vrot.slane %v3030_v60, 6 }
 0x4e3   :  { %v998_v25 = vsel %vm997_vm13, %v1503_v5, %v994_v32 }
 0x4e4   :  { %v1003_v59 = vsel %vm1000_vm14, %v1002_v36, %v998_v25  ;;  %v1190_v32 = vrot.slane %v263_v39, 6 }
 0x4e5   :  { %v1004_v26 = vmul.f32 %v1003_v59, %v2881_v3 }
 0x4e7   :  { %1504 = vtanh.f32 %v1004_v26 }
 0x4ed   :  { %v1505_v13 = vpop.eup %1504 }
 0x4ee   :  { %1007 = vst [vmem:[#allocation3 + $0xa] sm:$0x3] %v1505_v13  ;;  %1026 = vmatmul.f32.vlgmr.msra.gmra.mxu2 %v1505_v13  ;;  %1046 = vmatmul.f32.vlgmr.msrb.gmra.mxu3 %v1505_v13 }
 0x4ef   :  { %1066 = vmatmul.f32.vlgmr.msrb.gmra.mxu0 %v1505_v13 }
 0x4f5   :  { %v1243_v18 = vld [vmem:[#allocation3 + $0xa] sm:$0x3] }
 0x4f6   :  { %1284 = vst [vmem:[#allocation1 + $0x21] ss:$4 sm:$0xff] %v1243_v18 }
 0x4f7   :  { %1309 = vmatmul.f32.vlgmr.msra.gmra.mxu0 %v1289_v55 }
 0x56c   :  { %v1067_v1 = vpop.f32.mrf.mxu0 }
 0x56d   :  { %v1079_v15 = vadd.f32 %v1077_v30, %v1067_v1  ;;  %v1187_v30 = vrot.slane %v263_v39, 4 }
 0x56f   :  { %v1080_v20 = vmul.f32 0.5, %v1079_v15  ;;  %v1184_v15 = vrot.slane %v263_v39, 2 }
 0x571   :  { %1506 = vtanh.f32 %v1080_v20  ;;  %v1047_v9 = vpop.f32.mrf.mxu3  ;;  %v1027_v45 = vpop.f32.mrf.mxu2 }
 0x572   :  { %v1076_v19 = vadd.f32 %v1074_v10, %v1047_v9  ;;  %v1073_v49 = vadd.f32 %v1071_v47, %v1027_v45 }
 0x574   :  { %v1310_v35 = vpop.f32.mrf.mxu0 }
 0x575   :  { %v1311_v40 = vadd.f32 %v2888_v29, %v1310_v35 }
 0x577   :  { %v1507_v44 = vpop.eup %1506  ;;  %v1318_v46 = vrot.slane %v1311_v40, 2  ;;  %v1319_v56 = vrot.slane %v1311_v40, 4  ;;  %v1320_v58 = vrot.slane %v1311_v40, 6  ;;  %1330 = vst [vmem:[%s2957_s10] sm:$0x3] %v1311_v40 }
 0x578   :  { %v1082_v61 = vadd.f32 1.0, %v1507_v44 }
 0x579   :  { %1331 = vst [vmem:[%s2957_s10 + $0x2] sm:$0x3] %v1318_v46 }
 0x57a   :  { %v1083_v28 = vmul.f32 0.5, %v1082_v61  ;;  %1332 = vst [vmem:[%s2957_s10 + $0x4] sm:$0x3] %v1319_v56 }
 0x57b   :  { %1333 = vst [vmem:[%s2957_s10 + $0x6] sm:$0x3] %v1320_v58 }
 0x57c   :  { %v1086_v11 = vsub.f32 0.0, %v1083_v28  ;;  %v1091_v31 = vsub.f32 %v2835_v24, %v1083_v28 }
 0x57e   :  { %v1087_v62 = vmul.f32 1.442695, %v1086_v11 }
 0x580   :  { %1508 = vpow2.f32 %v1087_v62 }
 0x586   :  { %v1509_v16 = vpop.eup %1508 }
 0x587   :  { %v1089_v23 = vmul.f32 %v1509_v16, %v2835_v24 }
 0x589   :  { %v2905_v34 = vmax.f32 %v1089_v23, %v1076_v19 }
 0x58b   :  { %v1092_v37 = vsub.f32 %v1091_v31, %v2905_v34  ;;  %v1095_v38 = vsub.f32 %v1076_v19, %v2905_v34 }
 0x58d   :  { %v1093_v41 = vmul.f32 1.442695, %v1092_v37  ;;  %v1096_v42 = vmul.f32 1.442695, %v1095_v38 }
 0x58f   :  { %1510 = vpow2.f32 %v1093_v41 }
 0x590   :  { %1512 = vpow2.f32 %v1096_v42 }
 0x591   :  { %1514 = vtanh.f32 %v1073_v49 }
 0x595   :  { %v1511_v48 = vpop.eup %1510 }
 0x596   :  { %v1101_v50 = vmul.f32 %v1511_v48, %v2869_v27  ;;  %v1513_v51 = vpop.eup %1512  ;;  %v1098_v7 = vmul.f32 %v1511_v48, %v2881_v3 }
 0x597   :  { %v1515_v24 = vpop.eup %1514 }
 0x598   :  { %v2910_v52 = vadd.f32 %v1513_v51, %v1101_v50  ;;  %v1085_v63 = vmul.f32 %v1515_v24, %v259_v8 }
 0x59a   :  { %1516 = vrcp.f32 %v2910_v52  ;;  %v1114_v22 = vand.u32 2147483648, %v2910_v52  ;;  %v1099_v21 = vmul.f32 %v1513_v51, %v1085_v63  ;;  %v1112_v27 = vand.u32 2147483647, %v2910_v52 }
 0x59b   :  { %vm1108_vm0 = vweird.f32 %v2910_v52 }
 0x59c   :  { %v1115_v5 = vor.u32 1.1754944e-38, %v1114_v22  ;;  %v1100_v57 = vadd.f32 %v1099_v21, %v1098_v7  ;;  %vm1113_vm2 = vcmp.eq.f32.partialorder %v1112_v27, 8.507059e+37 }
 0x5a0   :  { %v1517_v12 = vpop.eup %1516 }
 0x5a1   :  { %v1104_v33 = vmul.f32 %v1517_v12, %v2910_v52  ;;  %vm1109_vm15 = vweird.f32 %v1517_v12 }
 0x5a2   :  { %vm1110_vm1 = vmor %vm1108_vm0, %vm1109_vm15 }
 0x5a3   :  { %v1105_v43 = vsub.f32 1.0, %v1104_v33 }
 0x5a5   :  { %v1106_v14 = vmul.f32 %v1517_v12, %v1105_v43 }
 0x5a7   :  { %v1107_v6 = vadd.f32 %v1517_v12, %v1106_v14 }
 0x5a9   :  { %v1111_v17 = vsel %vm1110_vm1, %v1517_v12, %v1107_v6 }
 0x5aa   :  { %v1116_v54 = vsel %vm1113_vm2, %v1115_v5, %v1111_v17 }
 0x5ab   :  { %v1117_v2 = vmul.f32 %v1116_v54, %v1100_v57 }
 0x5ad   :  { %1518 = vtanh.f32 %v1117_v2 }
 0x5b3   :  { %v1519_v53 = vpop.eup %1518 }
 0x5b4   :  { %1120 = vst [vmem:[#allocation3 + $0xc] sm:$0x3] %v1519_v53  ;;  %1139 = vmatmul.f32.vlgmr.msra.gmra.mxu1 %v1519_v53  ;;  %1159 = vmatmul.f32.vlgmr.msrb.gmra.mxu2 %v1519_v53 }
 0x5b5   :  { %1179 = vmatmul.f32.vlgmr.msra.gmra.mxu3 %v1519_v53 }
 0x5bb   :  { %v1244_v0 = vld [vmem:[#allocation3 + $0xc] sm:$0x3] }
 0x5bc   :  { %1286 = vst [vmem:[#allocation1 + $0x22] ss:$4 sm:$0xff] %v1244_v0 }
 0x631   :  { %v1140_v8 = vpop.f32.mrf.mxu1 }
 0x632   :  { %v1186_v40 = vadd.f32 %v1184_v15, %v1140_v8 }
 0x637   :  { %v1160_v4 = vpop.f32.mrf.mxu2 }
 0x638   :  { %v1180_v36 = vpop.f32.mrf.mxu3  ;;  %v1189_v20 = vadd.f32 %v1187_v30, %v1160_v4 }
 0x639   :  { %v1192_v3 = vadd.f32 %v1190_v32, %v1180_v36 }
 0x63b   :  { %v1193_v25 = vmul.f32 0.5, %v1192_v3 }
 0x63d   :  { %1520 = vtanh.f32 %v1193_v25 }
 0x643   :  { %v1521_v59 = vpop.eup %1520 }
 0x644   :  { %v1195_v26 = vadd.f32 1.0, %v1521_v59 }
 0x646   :  { %v1196_v13 = vmul.f32 0.5, %v1195_v26 }
 0x648   :  { %v1199_v18 = vsub.f32 0.0, %v1196_v13  ;;  %v1204_v46 = vsub.f32 %v2905_v34, %v1196_v13 }
 0x64a   :  { %v1200_v55 = vmul.f32 1.442695, %v1199_v18 }
 0x64c   :  { %1522 = vpow2.f32 %v1200_v55 }
 0x64d   :  { %1524 = vtanh.f32 %v1186_v40 }
 0x652   :  { %v1523_v1 = vpop.eup %1522 }
 0x653   :  { %v1202_v35 = vmul.f32 %v1523_v1, %v2905_v34  ;;  %v1525_v11 = vpop.eup %1524 }
 0x654   :  { %v1198_v9 = vmul.f32 %v1525_v11, %v263_v39 }
 0x655   :  { %v1203_v44 = vmax.f32 %v1202_v35, %v1189_v20 }
 0x657   :  { %v1205_v56 = vsub.f32 %v1204_v46, %v1203_v44  ;;  %v1208_v58 = vsub.f32 %v1189_v20, %v1203_v44  ;;  %1237 = vst [vmem:[#allocation9] sm:$0x3] %v1203_v44 }
 0x658   :  { %1383 = dma.vmem_to_hbm [thread:$0]  %s1379_s11, 32, %s1381_s8, [#allocation10]  }
 0x659   :  { %v1206_v61 = vmul.f32 1.442695, %v1205_v56  ;;  %v1209_v28 = vmul.f32 1.442695, %v1208_v58 }
 0x65b   :  { %1526 = vpow2.f32 %v1206_v61 }
 0x65c   :  { %1528 = vpow2.f32 %v1209_v28 }
 0x661   :  { %v1527_v62 = vpop.eup %1526 }
 0x662   :  { %v1529_v10 = vpop.eup %1528  ;;  %v1211_v16 = vmul.f32 %v1527_v62, %v1100_v57  ;;  %v1214_v19 = vmul.f32 %v1527_v62, %v2910_v52 }
 0x663   :  { %v1212_v23 = vmul.f32 %v1529_v10, %v1198_v9 }
 0x664   :  { %v1215_v31 = vadd.f32 %v1529_v10, %v1214_v19 }
 0x665   :  { %v1213_v37 = vadd.f32 %v1212_v23, %v1211_v16 }
 0x666   :  { %1530 = vrcp.f32 %v1215_v31  ;;  %1235 = vst [vmem:[#allocation6] sm:$0x3] %v1215_v31  ;;  %v1227_v42 = vand.u32 2147483648, %v1215_v31  ;;  %v1225_v47 = vand.u32 2147483647, %v1215_v31  ;;  %vm1221_vm4 = vweird.f32 %v1215_v31 }
 0x667   :  { %1234 = vst [vmem:[#allocation4] sm:$0x3] %v1213_v37  ;;  %1361 = dma.vmem_to_hbm [thread:$0]  %s1357_s7, 32, %s1359_s1, [#allocation7]  }
 0x668   :  { %v1228_v49 = vor.u32 1.1754944e-38, %v1227_v42  ;;  %vm1226_vm6 = vcmp.eq.f32.partialorder %v1225_v47, 8.507059e+37  ;;  %1350 = dma.vmem_to_hbm [thread:$0]  %s1346_s28, 32, %s1348_s27, [#allocation5]  }
 0x66c   :  { %v1531_v34 = vpop.eup %1530 }
 0x66d   :  { %v1217_v38 = vmul.f32 %v1531_v34, %v1215_v31  ;;  %vm1222_vm3 = vweird.f32 %v1531_v34 }
 0x66e   :  { %vm1223_vm5 = vmor %vm1221_vm4, %vm1222_vm3 }
 0x66f   :  { %v1218_v41 = vsub.f32 1.0, %v1217_v38 }
 0x671   :  { %v1219_v45 = vmul.f32 %v1531_v34, %v1218_v41 }
 0x673   :  { %v1220_v48 = vadd.f32 %v1531_v34, %v1219_v45 }
 0x675   :  { %v1224_v50 = vsel %vm1223_vm5, %v1531_v34, %v1220_v48 }
 0x676   :  { %v1229_v51 = vsel %vm1226_vm6, %v1228_v49, %v1224_v50 }
 0x677   :  { %v1230_v52 = vmul.f32 %v1229_v51, %v1213_v37 }
 0x679   :  { %1532 = vtanh.f32 %v1230_v52 }
 0x67f   :  { %v1533_v24 = vpop.eup %1532 }
 0x680   :  { %1233 = vst [vmem:[#allocation3 + $0xe] sm:$0x3] %v1533_v24 }
 0x681   :  { %1236 = vst [vmem:[#allocation8] sm:$0x3] %v1533_v24 }
 0x682   :  { %1372 = dma.vmem_to_hbm [thread:$0]  %s1368_s30, 32, %s1370_s0, [#allocation7]  }
 0x687   :  { %v1245_v12 = vld [vmem:[#allocation3 + $0xe] sm:$0x3] }
 0x688   :  { %1288 = vst [vmem:[#allocation1 + $0x23] ss:$4 sm:$0xff] %v1245_v12 }
 0x68f   :  { %v1290_v33 = vld.sshfl [vmem:[#allocation1 + $0x20] sm:$0xff pattern:$0x73625140] }
 0x690   :  { %1312 = vmatmul.f32.gmra.mxu0 %v1290_v33 }
 0x70d   :  { %v1313_v63 = vpop.f32.mrf.mxu0 }
 0x70e   :  { %v1314_v43 = vadd.f32 %v2888_v29, %v1313_v63 }
 0x710   :  { %v1321_v7 = vrot.slane %v1314_v43, 2  ;;  %v1322_v22 = vrot.slane %v1314_v43, 4  ;;  %v1323_v21 = vrot.slane %v1314_v43, 6  ;;  %1334 = vst [vmem:[%s2957_s10 + $0x8] sm:$0x3] %v1314_v43 }
 0x712   :  { %1335 = vst [vmem:[%s2957_s10 + $0xa] sm:$0x3] %v1321_v7 }
 0x713   :  { %1336 = vst [vmem:[%s2957_s10 + $0xc] sm:$0x3] %v1322_v22 }
 0x714   :  { %1337 = vst [vmem:[%s2957_s10 + $0xe] sm:$0x3] %v1323_v21 }
 0x715   :  { %1678 = dma.done.wait [#allocation5], 32  }
 0x716   :  { %1679 = vsyncadd [#allocation5], 4294967264 }
 0x717   :  { %1680 = dma.done.wait [#allocation7], 64  }
 0x718   :  { %1681 = vsyncadd [#allocation7], 4294967232 }
 0x719   :  { %1682 = dma.done.wait [#allocation10], 32  }
 0x71a   :  { %1683 = vsyncadd [#allocation10], 4294967264 }
 0x71b   :  { %1402 = vsyncpa [#allocation5], 1 }
 0x71c   :  { %1403 = vsyncpa [#allocation7], 1 }
 0x71d   :  { %1404 = vsyncpa [#allocation10], 1 }

</bundles_post_ra>
